<compile_context>
chip_gen: v5e
topology: v5e:2x2
jax: 0.10.0
libtpu: 0.0.40
codegen_flags: <defaults>
</compile_context>

<pallas_src>
import functools

import jax
import jax.numpy as jnp
from jax.experimental import pallas as pl
from jax.experimental.pallas import tpu as pltpu

LANE = 128


def _round_up(a, m):
    return ((a + m - 1) // m) * m


# ----------------------------------------------------------------------------
# Pallas fused matmul + affine (+ optional ReLU) kernel
# ----------------------------------------------------------------------------
def _mm_affine_kernel(x_ref, w_ref, s_ref, b_ref, o_ref, *, apply_relu):
    acc = jnp.dot(x_ref[...], w_ref[...], preferred_element_type=jnp.float32)
    y = acc * s_ref[...] + b_ref[...]
    if apply_relu:
        y = jnp.maximum(y, 0.0)
    o_ref[...] = y.astype(o_ref.dtype)


def _choose_tm(M):
    if M >= 512 and M % 256 == 0:
        return 256
    if M >= 256 and M % 128 == 0:
        return 128
    if M >= 16 and M % 16 == 0:
        return max(8, M // 2)
    return min(_round_up(M, 8), 256)


def pallas_matmul_affine(x, w, scale, shift, apply_relu):
    """relu?((x @ w) * scale + shift); x:(M,K), w:(K,Np) bf16, scale/shift:(1,Np) f32."""
    M, K = x.shape
    Kw, Np = w.shape
    assert K == Kw and Np % LANE == 0

    tm = _choose_tm(M)
    Mp = _round_up(M, tm)
    tn = 256 if Np % 256 == 0 else LANE

    xp = x.astype(jnp.bfloat16)
    if Mp != M:
        xp = jnp.pad(xp, ((0, Mp - M), (0, 0)))

    cost = pl.CostEstimate(
        flops=2 * Mp * K * Np,
        transcendentals=0,
        bytes_accessed=Mp * K * 2 + K * Np * 2 + Mp * Np * 2 + 2 * 4 * Np,
    )

    out = pl.pallas_call(
        functools.partial(_mm_affine_kernel, apply_relu=apply_relu),
        out_shape=jax.ShapeDtypeStruct((Mp, Np), jnp.bfloat16),
        grid_spec=pltpu.PrefetchScalarGridSpec(
            num_scalar_prefetch=0,
            grid=(Mp // tm, Np // tn),
            in_specs=[
                pl.BlockSpec((tm, K), lambda i, j: (i, 0)),   # full K per step
                pl.BlockSpec((K, tn), lambda i, j: (0, j)),
                pl.BlockSpec((1, tn), lambda i, j: (0, j)),
                pl.BlockSpec((1, tn), lambda i, j: (0, j)),
            ],
            out_specs=pl.BlockSpec((tm, tn), lambda i, j: (i, j)),
        ),
        compiler_params=pltpu.CompilerParams(
            dimension_semantics=("parallel", "parallel")),
        cost_estimate=cost,
    )(xp, w, scale, shift)
    return out[:M]


# ----------------------------------------------------------------------------
# JAX glue: im2col patches, pooling, nearest interpolate
# ----------------------------------------------------------------------------
def extract_patches(x, kh, kw, stride, pad):
    # x: (B, H, W, C) bf16 -> (B*Ho*Wo, kh*kw*C), patch order (dy, dx, c)
    B, H, W, C = x.shape
    xp = jnp.pad(x, ((0, 0), (pad, pad), (pad, pad), (0, 0)))
    Ho = (H + 2 * pad - kh) // stride + 1
    Wo = (W + 2 * pad - kw) // stride + 1
    cols = []
    for dy in range(kh):
        for dx in range(kw):
            sl = jax.lax.slice(
                xp,
                (0, dy, dx, 0),
                (B, dy + (Ho - 1) * stride + 1, dx + (Wo - 1) * stride + 1, C),
                (1, stride, stride, 1))
            cols.append(sl)
    patches = jnp.concatenate(cols, axis=-1)
    return patches.reshape(B * Ho * Wo, kh * kw * C), Ho, Wo


def conv_gemm(x, packed, kh, kw, stride, pad, n_out, relu=True):
    """Conv (im2col GEMM) with fused folded-BN affine and optional ReLU."""
    B, H, W, C = x.shape
    if kh == 1 and kw == 1 and stride == 1 and pad == 0:
        patches, Ho, Wo = x.reshape(B * H * W, C), H, W
    else:
        patches, Ho, Wo = extract_patches(x, kh, kw, stride, pad)
    out = pallas_matmul_affine(patches, packed["wm"], packed["scale"],
                               packed["shift"], relu)
    out = out[:, :n_out]
    return out.reshape(B, Ho, Wo, n_out)


def max_pool_3x3_s2_p1(x):
    # F.max_pool2d(x, kernel_size=3, stride=2, padding=1); -inf padding.
    neg = jnp.array(-jnp.inf, x.dtype)
    return jax.lax.reduce_window(
        x, neg, jax.lax.max,
        (1, 3, 3, 1), (1, 2, 2, 1),
        ((0, 0), (1, 1), (1, 1), (0, 0)))


def interpolate_nearest(x, size):
    # F.interpolate(x, size=size) default mode='nearest'
    B, H, W, C = x.shape
    Ho, Wo = size
    if (Ho, Wo) == (H, W):
        return x
    hi = (jnp.arange(Ho) * H) // Ho
    wi = (jnp.arange(Wo) * W) // Wo
    return x[:, hi, :, :][:, :, wi, :]


# ----------------------------------------------------------------------------
# Parameter construction (deterministic, synthetic; packed once at init)
# ----------------------------------------------------------------------------
def make_conv_w(key, kh, kw, cin, cout):
    fan_in = kh * kw * cin
    return jax.random.normal(key, (kh, kw, cin, cout), jnp.float32) * jnp.sqrt(2.0 / fan_in)


def make_bn_fold(key, c, eps=1e-5):
    k1, k2 = jax.random.split(key)
    gamma = 1.0 + 0.1 * jax.random.normal(k1, (c,), jnp.float32)
    beta = 0.1 * jax.random.normal(k2, (c,), jnp.float32)
    mean = jnp.zeros((c,), jnp.float32)
    var = jnp.ones((c,), jnp.float32)
    scale = gamma / jnp.sqrt(var + eps)       # fold BN (eval mode)
    shift = beta - mean * scale
    return scale, shift


def pack_conv(w, scale, shift):
    # Reshape + N-pad to 128 lanes + cast to bf16 ONCE, outside the jit path.
    kh, kw, cin, cout = w.shape
    K = kh * kw * cin
    Np = _round_up(cout, LANE)
    wm = jnp.pad(w.reshape(K, cout), ((0, 0), (0, Np - cout))).astype(jnp.bfloat16)
    s = jnp.pad(scale, (0, Np - cout)).astype(jnp.float32).reshape(1, Np)
    b = jnp.pad(shift, (0, Np - cout)).astype(jnp.float32).reshape(1, Np)
    return {"wm": wm, "scale": s, "shift": b}


def make_block_raw(key, c):
    k1, k2, k3, k4 = jax.random.split(key, 4)
    w1 = make_conv_w(k1, 3, 3, c, c)
    s1, b1 = make_bn_fold(k2, c)
    w2 = make_conv_w(k3, 3, 3, c, c)
    s2, b2 = make_bn_fold(k4, c)
    return {"w1": w1, "s1": s1, "b1": b1, "w2": w2, "s2": s2, "b2": b2}


def pack_block(r):
    return {"c1": pack_conv(r["w1"], r["s1"], r["b1"]),
            "c2": pack_conv(r["w2"], r["s2"], r["b2"])}


BLOCK_NAMES = ["pre", "trunk0", "trunk1", "resdown1", "resdown2", "resdown3",
               "resup1", "resup2", "resup3", "shortcut", "last"]


def init_params(key, c):
    keys = jax.random.split(key, len(BLOCK_NAMES) + 6)
    raw = {n: make_block_raw(keys[i], c) for i, n in enumerate(BLOCK_NAMES)}
    params = {n: pack_block(raw[n]) for n in BLOCK_NAMES}

    # Merged first conv of soft_resdown1 / soft_resdown2 (identical pooled input):
    # N = 2*c = 128 exactly fills one lane tile (no N-padding waste).
    w_m = jnp.concatenate([raw["resdown1"]["w1"], raw["resdown2"]["w1"]], axis=3)
    s_m = jnp.concatenate([raw["resdown1"]["s1"], raw["resdown2"]["s1"]])
    b_m = jnp.concatenate([raw["resdown1"]["b1"], raw["resdown2"]["b1"]])
    params["resdown12_c1"] = pack_conv(w_m, s_m, b_m)

    # "sigmoid" branch: BN -> ReLU -> Conv1x1(+bias) -> BN -> ReLU -> Conv1x1(+bias) -> ReLU
    k = keys[len(BLOCK_NAMES):]
    bn0_s, bn0_b = make_bn_fold(k[0], c)
    w1 = make_conv_w(k[1], 1, 1, c, c)
    bias1 = 0.01 * jax.random.normal(k[2], (c,), jnp.float32)
    bn1_s, bn1_b = make_bn_fold(k[3], c)
    w2 = make_conv_w(k[4], 1, 1, c, c)
    bias2 = 0.01 * jax.random.normal(k[5], (c,), jnp.float32)
    params["sig"] = {
        "bn0_scale": bn0_s, "bn0_shift": bn0_b,
        # conv1x1 bias and the following BN folded into the GEMM epilogue
        "c1": pack_conv(w1, bn1_s, bn1_s * bias1 + bn1_b),
        # final conv1x1 + bias, then ReLU
        "c2": pack_conv(w2, jnp.ones((c,), jnp.float32), bias2),
    }
    return params


# ----------------------------------------------------------------------------
# Forward pass (AttentionModule2.forward)
# ----------------------------------------------------------------------------
@jax.jit
def attention_module2_forward(params, x_nchw):
    C = params["sig"]["bn0_scale"].shape[0]
    x = jnp.transpose(x_nchw, (0, 2, 3, 1)).astype(jnp.bfloat16)   # NCHW -> NHWC

    def block(y, bp):
        # Block.forward: relu(bn2(conv2(relu(bn1(conv1(y)))))) — residual unused.
        y = conv_gemm(y, bp["c1"], 3, 3, 1, 1, C, relu=True)
        y = conv_gemm(y, bp["c2"], 3, 3, 1, 1, C, relu=True)
        return y

    x0 = block(x, params["pre"])                         # self.pre
    H, W = x0.shape[1], x0.shape[2]                      # input_size

    x_t = block(block(x0, params["trunk0"]), params["trunk1"])   # self.trunk

    # Both F.max_pool2d calls pool the same x -> compute once, reuse.
    p = max_pool_3x3_s2_p1(x0)

    # soft_resdown1 / soft_resdown2 first convs merged into one GEMM (same input p).
    mid = conv_gemm(p, params["resdown12_c1"], 3, 3, 1, 1, 2 * C, relu=True)
    d1 = conv_gemm(mid[..., :C], params["resdown1"]["c2"], 3, 3, 1, 1, C, relu=True)
    h1, w1 = d1.shape[1], d1.shape[2]                    # shape1
    shortcut = block(d1, params["shortcut"])             # self.shortcut

    d2 = conv_gemm(mid[..., C:], params["resdown2"]["c2"], 3, 3, 1, 1, C, relu=True)
    d3 = block(d2, params["resdown3"])
    u1 = block(d3, params["resup1"])
    u2 = block(u1, params["resup2"])
    u2 = interpolate_nearest(u2, (h1, w1))
    s = u2 + shortcut
    u3 = block(s, params["resup3"])
    u3 = interpolate_nearest(u3, (H, W))

    # "sigmoid" branch (spec actually ends in ReLU, not Sigmoid).
    sg = params["sig"]
    y = jnp.maximum(u3.astype(jnp.float32) * sg["bn0_scale"] + sg["bn0_shift"], 0.0)
    y = y.astype(jnp.bfloat16)
    y = conv_gemm(y, sg["c1"], 1, 1, 1, 0, C, relu=True)
    y = conv_gemm(y, sg["c2"], 1, 1, 1, 0, C, relu=True)

    gated = (1.0 + y.astype(jnp.float32)) * x_t.astype(jnp.float32)
    out = block(gated.astype(jnp.bfloat16), params["last"])      # self.last

    return jnp.transpose(out.astype(jnp.float32), (0, 3, 1, 2))  # back to NCHW


if __name__ == "__main__":
    C = 64          # in_channels == out_channels (module asserts equality)
    B, H, W = 2, 16, 16
    key = jax.random.PRNGKey(0)
    pkey, xkey = jax.random.split(key)
    params = init_params(pkey, C)
    x = jax.random.normal(xkey, (B, C, H, W), jnp.float32)   # NCHW like PyTorch

    out = attention_module2_forward(params, x)
    out = jax.block_until_ready(out)

    assert out.shape == (B, C, H, W), out.shape
    assert bool(jnp.all(jnp.isfinite(out)))
    print("KERNEL_OK")
</pallas_src>

<mosaic_0001>
module attributes {stable_mosaic.version = 11 : i64} {
  func.func @_mm_affine_kernel(%arg0: i32, %arg1: i32, %arg2: memref<256x576xbf16, #tpu.memory_space<vmem>>, %arg3: memref<576x128xbf16, #tpu.memory_space<vmem>>, %arg4: memref<1x128xf32, #tpu.memory_space<vmem>>, %arg5: memref<1x128xf32, #tpu.memory_space<vmem>>, %arg6: memref<256x128xbf16, #tpu.memory_space<vmem>>) attributes {dimension_semantics = [#tpu.dimension_semantics<parallel>, #tpu.dimension_semantics<parallel>], iteration_bounds = array<i64: 2, 1>, scalar_prefetch = 0 : i64, scratch_operands = 0 : i64, tpu.core_type = #tpu.core_type<tc>, window_params = [{transform_indices = @transform_0, window_bounds = array<i64: 256, 576>}, {transform_indices = @transform_1, window_bounds = array<i64: 576, 128>}, {transform_indices = @transform_2, window_bounds = array<i64: 1, 128>}, {transform_indices = @transform_3, window_bounds = array<i64: 1, 128>}, {transform_indices = @transform_4, window_bounds = array<i64: 256, 128>}]} {
    %c0 = arith.constant 0 : index
    %c0_0 = arith.constant 0 : index
    %0 = vector.load %arg2[%c0, %c0_0] : memref<256x576xbf16, #tpu.memory_space<vmem>>, vector<256x576xbf16>
    %c0_1 = arith.constant 0 : index
    %c0_2 = arith.constant 0 : index
    %1 = vector.load %arg3[%c0_1, %c0_2] : memref<576x128xbf16, #tpu.memory_space<vmem>>, vector<576x128xbf16>
    %cst = arith.constant dense<0.000000e+00> : vector<256x128xf32>
    %2 = tpu.matmul %0, %1, %cst {dimension_numbers = #tpu.dot_dimension_numbers<[1], [0], [0], [1], [0, 0, 1, 1], [], []>} : vector<256x576xbf16>, vector<576x128xbf16>, vector<256x128xf32> -> vector<256x128xf32>
    %c0_3 = arith.constant 0 : index
    %c0_4 = arith.constant 0 : index
    %3 = vector.load %arg4[%c0_3, %c0_4] : memref<1x128xf32, #tpu.memory_space<vmem>>, vector<1x128xf32>
    %4 = vector.broadcast %3 : vector<1x128xf32> to vector<256x128xf32>
    %5 = arith.mulf %2, %4 : vector<256x128xf32>
    %c0_5 = arith.constant 0 : index
    %c0_6 = arith.constant 0 : index
    %6 = vector.load %arg5[%c0_5, %c0_6] : memref<1x128xf32, #tpu.memory_space<vmem>>, vector<1x128xf32>
    %7 = vector.broadcast %6 : vector<1x128xf32> to vector<256x128xf32>
    %8 = arith.addf %5, %7 : vector<256x128xf32>
    %cst_7 = arith.constant 0.000000e+00 : f32
    %9 = vector.broadcast %cst_7 : f32 to vector<256x128xf32>
    %10 = arith.maximumf %8, %9 : vector<256x128xf32>
    %11 = arith.truncf %10 : vector<256x128xf32> to vector<256x128xbf16>
    %c0_8 = arith.constant 0 : index
    %c0_9 = arith.constant 0 : index
    %12 = vector.load %arg6[%c0_8, %c0_9] : memref<256x128xbf16, #tpu.memory_space<vmem>>, vector<256x128xbf16>
    tpu.vector_store %arg6[%c0_8, %c0_9], %11 {strides = array<i32>} : memref<256x128xbf16, #tpu.memory_space<vmem>>, vector<256x128xbf16>,
    return
  }
  func.func @transform_0(%arg0: i32, %arg1: i32) -> (i32, i32) {
    %c0_i32 = arith.constant 0 : i32
    %c0_i32_0 = arith.constant 0 : i32
    return %arg0, %c0_i32 : i32, i32
  }
  func.func @transform_1(%arg0: i32, %arg1: i32) -> (i32, i32) {
    %c0_i32 = arith.constant 0 : i32
    %c0_i32_0 = arith.constant 0 : i32
    return %c0_i32, %arg1 : i32, i32
  }
  func.func @transform_2(%arg0: i32, %arg1: i32) -> (i32, i32) {
    %c0_i32 = arith.constant 0 : i32
    %c0_i32_0 = arith.constant 0 : i32
    return %c0_i32, %arg1 : i32, i32
  }
  func.func @transform_3(%arg0: i32, %arg1: i32) -> (i32, i32) {
    %c0_i32 = arith.constant 0 : i32
    %c0_i32_0 = arith.constant 0 : i32
    return %c0_i32, %arg1 : i32, i32
  }
  func.func @transform_4(%arg0: i32, %arg1: i32) -> (i32, i32) {
    %c0_i32 = arith.constant 0 : i32
    return %arg0, %arg1 : i32, i32
  }
}

module attributes {stable_mosaic.version = 11 : i64} {
  func.func @_mm_affine_kernel(%arg0: i32, %arg1: i32, %arg2: memref<64x576xbf16, #tpu.memory_space<vmem>>, %arg3: memref<576x128xbf16, #tpu.memory_space<vmem>>, %arg4: memref<1x128xf32, #tpu.memory_space<vmem>>, %arg5: memref<1x128xf32, #tpu.memory_space<vmem>>, %arg6: memref<64x128xbf16, #tpu.memory_space<vmem>>) attributes {dimension_semantics = [#tpu.dimension_semantics<parallel>, #tpu.dimension_semantics<parallel>], iteration_bounds = array<i64: 2, 1>, scalar_prefetch = 0 : i64, scratch_operands = 0 : i64, tpu.core_type = #tpu.core_type<tc>, window_params = [{transform_indices = @transform_0, window_bounds = array<i64: 64, 576>}, {transform_indices = @transform_1, window_bounds = array<i64: 576, 128>}, {transform_indices = @transform_2, window_bounds = array<i64: 1, 128>}, {transform_indices = @transform_3, window_bounds = array<i64: 1, 128>}, {transform_indices = @transform_4, window_bounds = array<i64: 64, 128>}]} {
    %c0 = arith.constant 0 : index
    %c0_0 = arith.constant 0 : index
    %0 = vector.load %arg2[%c0, %c0_0] : memref<64x576xbf16, #tpu.memory_space<vmem>>, vector<64x576xbf16>
    %c0_1 = arith.constant 0 : index
    %c0_2 = arith.constant 0 : index
    %1 = vector.load %arg3[%c0_1, %c0_2] : memref<576x128xbf16, #tpu.memory_space<vmem>>, vector<576x128xbf16>
    %cst = arith.constant dense<0.000000e+00> : vector<64x128xf32>
    %2 = tpu.matmul %0, %1, %cst {dimension_numbers = #tpu.dot_dimension_numbers<[1], [0], [0], [1], [0, 0, 1, 1], [], []>} : vector<64x576xbf16>, vector<576x128xbf16>, vector<64x128xf32> -> vector<64x128xf32>
    %c0_3 = arith.constant 0 : index
    %c0_4 = arith.constant 0 : index
    %3 = vector.load %arg4[%c0_3, %c0_4] : memref<1x128xf32, #tpu.memory_space<vmem>>, vector<1x128xf32>
    %4 = vector.broadcast %3 : vector<1x128xf32> to vector<64x128xf32>
    %5 = arith.mulf %2, %4 : vector<64x128xf32>
    %c0_5 = arith.constant 0 : index
    %c0_6 = arith.constant 0 : index
    %6 = vector.load %arg5[%c0_5, %c0_6] : memref<1x128xf32, #tpu.memory_space<vmem>>, vector<1x128xf32>
    %7 = vector.broadcast %6 : vector<1x128xf32> to vector<64x128xf32>
    %8 = arith.addf %5, %7 : vector<64x128xf32>
    %cst_7 = arith.constant 0.000000e+00 : f32
    %9 = vector.broadcast %cst_7 : f32 to vector<64x128xf32>
    %10 = arith.maximumf %8, %9 : vector<64x128xf32>
    %11 = arith.truncf %10 : vector<64x128xf32> to vector<64x128xbf16>
    %c0_8 = arith.constant 0 : index
    %c0_9 = arith.constant 0 : index
    %12 = vector.load %arg6[%c0_8, %c0_9] : memref<64x128xbf16, #tpu.memory_space<vmem>>, vector<64x128xbf16>
    tpu.vector_store %arg6[%c0_8, %c0_9], %11 {strides = array<i32>} : memref<64x128xbf16, #tpu.memory_space<vmem>>, vector<64x128xbf16>,
    return
  }
  func.func @transform_0(%arg0: i32, %arg1: i32) -> (i32, i32) {
    %c0_i32 = arith.constant 0 : i32
    %c0_i32_0 = arith.constant 0 : i32
    return %arg0, %c0_i32 : i32, i32
  }
  func.func @transform_1(%arg0: i32, %arg1: i32) -> (i32, i32) {
    %c0_i32 = arith.constant 0 : i32
    %c0_i32_0 = arith.constant 0 : i32
    return %c0_i32, %arg1 : i32, i32
  }
  func.func @transform_2(%arg0: i32, %arg1: i32) -> (i32, i32) {
    %c0_i32 = arith.constant 0 : i32
    %c0_i32_0 = arith.constant 0 : i32
    return %c0_i32, %arg1 : i32, i32
  }
  func.func @transform_3(%arg0: i32, %arg1: i32) -> (i32, i32) {
    %c0_i32 = arith.constant 0 : i32
    %c0_i32_0 = arith.constant 0 : i32
    return %c0_i32, %arg1 : i32, i32
  }
  func.func @transform_4(%arg0: i32, %arg1: i32) -> (i32, i32) {
    %c0_i32 = arith.constant 0 : i32
    return %arg0, %arg1 : i32, i32
  }
}

module attributes {stable_mosaic.version = 11 : i64} {
  func.func @_mm_affine_kernel(%arg0: i32, %arg1: i32, %arg2: memref<256x64xbf16, #tpu.memory_space<vmem>>, %arg3: memref<64x128xbf16, #tpu.memory_space<vmem>>, %arg4: memref<1x128xf32, #tpu.memory_space<vmem>>, %arg5: memref<1x128xf32, #tpu.memory_space<vmem>>, %arg6: memref<256x128xbf16, #tpu.memory_space<vmem>>) attributes {dimension_semantics = [#tpu.dimension_semantics<parallel>, #tpu.dimension_semantics<parallel>], iteration_bounds = array<i64: 2, 1>, scalar_prefetch = 0 : i64, scratch_operands = 0 : i64, tpu.core_type = #tpu.core_type<tc>, window_params = [{transform_indices = @transform_0, window_bounds = array<i64: 256, 64>}, {transform_indices = @transform_1, window_bounds = array<i64: 64, 128>}, {transform_indices = @transform_2, window_bounds = array<i64: 1, 128>}, {transform_indices = @transform_3, window_bounds = array<i64: 1, 128>}, {transform_indices = @transform_4, window_bounds = array<i64: 256, 128>}]} {
    %c0 = arith.constant 0 : index
    %c0_0 = arith.constant 0 : index
    %0 = vector.load %arg2[%c0, %c0_0] : memref<256x64xbf16, #tpu.memory_space<vmem>>, vector<256x64xbf16>
    %c0_1 = arith.constant 0 : index
    %c0_2 = arith.constant 0 : index
    %1 = vector.load %arg3[%c0_1, %c0_2] : memref<64x128xbf16, #tpu.memory_space<vmem>>, vector<64x128xbf16>
    %cst = arith.constant dense<0.000000e+00> : vector<256x128xf32>
    %2 = tpu.matmul %0, %1, %cst {dimension_numbers = #tpu.dot_dimension_numbers<[1], [0], [0], [1], [0, 0, 1, 1], [], []>} : vector<256x64xbf16>, vector<64x128xbf16>, vector<256x128xf32> -> vector<256x128xf32>
    %c0_3 = arith.constant 0 : index
    %c0_4 = arith.constant 0 : index
    %3 = vector.load %arg4[%c0_3, %c0_4] : memref<1x128xf32, #tpu.memory_space<vmem>>, vector<1x128xf32>
    %4 = vector.broadcast %3 : vector<1x128xf32> to vector<256x128xf32>
    %5 = arith.mulf %2, %4 : vector<256x128xf32>
    %c0_5 = arith.constant 0 : index
    %c0_6 = arith.constant 0 : index
    %6 = vector.load %arg5[%c0_5, %c0_6] : memref<1x128xf32, #tpu.memory_space<vmem>>, vector<1x128xf32>
    %7 = vector.broadcast %6 : vector<1x128xf32> to vector<256x128xf32>
    %8 = arith.addf %5, %7 : vector<256x128xf32>
    %cst_7 = arith.constant 0.000000e+00 : f32
    %9 = vector.broadcast %cst_7 : f32 to vector<256x128xf32>
    %10 = arith.maximumf %8, %9 : vector<256x128xf32>
    %11 = arith.truncf %10 : vector<256x128xf32> to vector<256x128xbf16>
    %c0_8 = arith.constant 0 : index
    %c0_9 = arith.constant 0 : index
    %12 = vector.load %arg6[%c0_8, %c0_9] : memref<256x128xbf16, #tpu.memory_space<vmem>>, vector<256x128xbf16>
    tpu.vector_store %arg6[%c0_8, %c0_9], %11 {strides = array<i32>} : memref<256x128xbf16, #tpu.memory_space<vmem>>, vector<256x128xbf16>,
    return
  }
  func.func @transform_0(%arg0: i32, %arg1: i32) -> (i32, i32) {
    %c0_i32 = arith.constant 0 : i32
    %c0_i32_0 = arith.constant 0 : i32
    return %arg0, %c0_i32 : i32, i32
  }
  func.func @transform_1(%arg0: i32, %arg1: i32) -> (i32, i32) {
    %c0_i32 = arith.constant 0 : i32
    %c0_i32_0 = arith.constant 0 : i32
    return %c0_i32, %arg1 : i32, i32
  }
  func.func @transform_2(%arg0: i32, %arg1: i32) -> (i32, i32) {
    %c0_i32 = arith.constant 0 : i32
    %c0_i32_0 = arith.constant 0 : i32
    return %c0_i32, %arg1 : i32, i32
  }
  func.func @transform_3(%arg0: i32, %arg1: i32) -> (i32, i32) {
    %c0_i32 = arith.constant 0 : i32
    %c0_i32_0 = arith.constant 0 : i32
    return %c0_i32, %arg1 : i32, i32
  }
  func.func @transform_4(%arg0: i32, %arg1: i32) -> (i32, i32) {
    %c0_i32 = arith.constant 0 : i32
    return %arg0, %arg1 : i32, i32
  }
}

</mosaic_0001>

<bundles_post_ra>
// kernel: attention_module2_forward.23
= control target key start
LH: loop header
LB: loop body
LE: loop exit
PB: predicated region body
PF: predicated region fallthrough
CT: control target
= control target key end

     0   :  { %s2635_s15 = smov 0   ;;  %s2637_s16 = smov 0   ;;  %s3149_s0 = inlined_call_operand.vmem [shape: bf16[512,576], index: 0, kind: input, shape index: {}]   ;;  %s3150_s1 = inlined_call_operand.vmem [shape: bf16[576,128], index: 1, kind: input, shape index: {}]   ;;  %s3151_s2 = inlined_call_operand.vmem [shape: f32[1,128], index: 2, kind: input, shape index: {}]   ;;  %s3152_s3 = inlined_call_operand.vmem [shape: f32[1,128], index: 3, kind: input, shape index: {}]   ;;  %s3153_s4 = inlined_call_operand.vmem [shape: bf16[512,128], index: 4, kind: output, shape index: {}]  }
   0x1   :  { %s2639_s17 = smov 0  }
   0x2 LB: > { %s26_s18 = sadd.s32 1, %s2604_s16  ;;  %p1837_p0 = scmp.ge.s32.totalorder %s2608_s17, 1  ;;  %s2608_s17 = sphi %s2639_s17, %s14_s17   ;;  %s2604_s16 = sphi %s2637_s16, %s3155_s16   ;;  %s2600_s15 = sphi %s2635_s15, %s3154_s15  }
   0x3   : > { %p28_p1 = scmp.ge.s32.totalorder %s26_s18, 2  ;;  %p203_p2 = scmp.lt.s32.totalorder %s2608_s17, 3 }
   0x5   : > { %s3157_s18 = smov (%p28_p1, %s26_s18), 0  ;;  %p204_p3 = pnand %p1837_p0, %p203_p2 }
   0x6   : > { %s1838_s25 = sshll.u32 (!%p204_p3), %s2600_s15, 5 }
   0x7   : > { %207 = sbr.rel (%p204_p3) target bundleno = 503 (0x1f7), region = 36  ;;  %p244_p4 = scmp.lt.s32.totalorder (!%p204_p3), %s1838_s25, 63 }
   0xc   : > { %v2411_v0 = vld [vmem:[%s3150_s1 + $0x38] sm:$0xff]  ;;  %v2410_v1 = vld [vmem:[%s3150_s1 + $0x30] sm:$0xff]  ;;  %v2409_v2 = vld [vmem:[%s3150_s1 + $0x28] sm:$0xff]  ;;  %s3159_s25 = smov (!%p244_p4, %s1838_s25), 63  ;;  %vm1054_vm0 = vcmask 523264  }
   0xd   : > { %2535 = vmatpush.bf16.msra.mxu1 %v2411_v0  ;;  %2536 = vmatpush.bf16.msra.mxu2 %v2411_v0  ;;  %v2408_v3 = vld [vmem:[%s3150_s1 + $0x20] sm:$0xff]  ;;  %v2407_v4 = vld [vmem:[%s3150_s1 + $0x18] sm:$0xff]  ;;  %v2406_v5 = vld [vmem:[%s3150_s1 + $0x10] sm:$0xff]  ;;  %s2559_s6 = smul.u32 20, %s3159_s25  ;;  %s1841_s10 = sshll.u32 %s3159_s25, 2 }
   0xe   : > { %2537 = vmatpush.bf16.msra.mxu3 %v2411_v0  ;;  %1103 = vmatpush.bf16.msra.mxu0 %v2411_v0  ;;  %v2405_v6 = vld [vmem:[%s3150_s1 + $0x8] sm:$0xff]  ;;  %v2404_v7 = vld [vmem:[%s3150_s1] sm:$0xff]  ;;  %v2427_v16 = vld [vmem:[%s3150_s1 + $0xb8] sm:$0xff]  ;;  %s2979_s14 = scalar_lea.vmem %s3153_s4, %s1841_s10 }
   0xf   : > { %s2683_s11 = scalar_lea.vmem %s3149_s0, %s2559_s6  ;;  %v2435_v17 = vld [vmem:[%s3150_s1 + $0xf8] sm:$0xff]  ;;  %v2426_v24 = vld [vmem:[%s3150_s1 + $0xb0] sm:$0xff]  ;;  %v2425_v28 = vld [vmem:[%s3150_s1 + $0xa8] sm:$0xff] }
  0x10   : > { %v1924_v8 = vld [vmem:[%s2683_s11 + $0xa0] sm:$0xf]  ;;  %v2346_v9 = vld [vmem:[%s2683_s11 + $0xb0] sm:$0xf0]  ;;  %v2419_v22 = vld [vmem:[%s3150_s1 + $0x78] sm:$0xff] }
  0x11   : > { %2538 = vmatpush.bf16.msra.mxu1 %v2410_v1  ;;  %2539 = vmatpush.bf16.msra.mxu2 %v2410_v1  ;;  %v2004_v10 = vld [vmem:[%s2683_s11 + $0x140] sm:$0xf]  ;;  %v2366_v11 = vld [vmem:[%s2683_s11 + $0x150] sm:$0xf0]  ;;  %v1925_v18 = vor.u32 %v2346_v9, %v1924_v8  ;;  %v2439_v23 = vld [vmem:[%s3150_s1 + $0x118] sm:$0xff] }
  0x12   : > { %2540 = vmatpush.bf16.msra.mxu3 %v2410_v1  ;;  %1104 = vmatpush.bf16.msra.mxu0 %v2410_v1  ;;  %v2084_v12 = vld [vmem:[%s2683_s11 + $0x1e0] sm:$0xf]  ;;  %v2386_v13 = vld [vmem:[%s2683_s11 + $0x1f0] sm:$0xf0]  ;;  %v2005_v19 = vor.u32 %v2366_v11, %v2004_v10  ;;  %v2433_v29 = vld [vmem:[%s3150_s1 + $0xe8] sm:$0xff] }
  0x13   : > { %v1844_v14 = vld [vmem:[%s2683_s11] sm:$0xf]  ;;  %v2326_v15 = vld [vmem:[%s2683_s11 + $0x10] sm:$0xf0]  ;;  %v2085_v20 = vor.u32 %v2386_v13, %v2084_v12  ;;  %v2417_v30 = vld [vmem:[%s3150_s1 + $0x68] sm:$0xff] }
  0x14   : > { %v1845_v21 = vor.u32 %v2326_v15, %v1844_v14  ;;  %v2434_v25 = vld [vmem:[%s3150_s1 + $0xf0] sm:$0xff]  ;;  %v2437_v31 = vld [vmem:[%s3150_s1 + $0x108] sm:$0xff]  ;;  %v2424_v32 = vld [vmem:[%s3150_s1 + $0xa0] sm:$0xff] }
  0x15   : > { %2541 = vmatpush.bf16.msra.mxu1 %v2409_v2  ;;  %2542 = vmatpush.bf16.msra.mxu2 %v2409_v2  ;;  %v2418_v26 = vld [vmem:[%s3150_s1 + $0x70] sm:$0xff]  ;;  %v2432_v33 = vld [vmem:[%s3150_s1 + $0xe0] sm:$0xff]  ;;  %v1944_v34 = vld [vmem:[%s2683_s11 + $0xc8] sm:$0xf] }
  0x16   : > { %2543 = vmatpush.bf16.msra.mxu3 %v2409_v2  ;;  %1105 = vmatpush.bf16.msra.mxu0 %v2409_v2  ;;  %v2438_v27 = vld [vmem:[%s3150_s1 + $0x110] sm:$0xff]  ;;  %v2351_v35 = vld [vmem:[%s2683_s11 + $0xd8] sm:$0xf0]  ;;  %v2024_v36 = vld [vmem:[%s2683_s11 + $0x168] sm:$0xf] }
  0x17   : > { %v2371_v37 = vld [vmem:[%s2683_s11 + $0x178] sm:$0xf0]  ;;  %v2104_v38 = vld [vmem:[%s2683_s11 + $0x208] sm:$0xf]  ;;  %v2416_v42 = vld [vmem:[%s3150_s1 + $0x60] sm:$0xff]  ;;  %v1945_v45 = vor.u32 %v2351_v35, %v1944_v34 }
  0x18   : > { %v2391_v39 = vld [vmem:[%s2683_s11 + $0x218] sm:$0xf0]  ;;  %v1864_v40 = vld [vmem:[%s2683_s11 + $0x28] sm:$0xf]  ;;  %v2025_v46 = vor.u32 %v2371_v37, %v2024_v36  ;;  %v2422_v50 = vld [vmem:[%s3150_s1 + $0x90] sm:$0xff] }
  0x19   : > { %2544 = vmatpush.bf16.msra.mxu1 %v2408_v3  ;;  %2545 = vmatpush.bf16.msra.mxu2 %v2408_v3  ;;  %v2331_v41 = vld [vmem:[%s2683_s11 + $0x38] sm:$0xf0]  ;;  %v2105_v47 = vor.u32 %v2391_v39, %v2104_v38  ;;  %v2430_v51 = vld [vmem:[%s3150_s1 + $0xd0] sm:$0xff]  ;;  %v2436_v53 = vld [vmem:[%s3150_s1 + $0x100] sm:$0xff] }
  0x1a   : > { %2546 = vmatpush.bf16.msra.mxu3 %v2408_v3  ;;  %1106 = vmatpush.bf16.msra.mxu0 %v2408_v3  ;;  %v2423_v43 = vld [vmem:[%s3150_s1 + $0x98] sm:$0xff]  ;;  %v1865_v48 = vor.u32 %v2331_v41, %v1864_v40  ;;  %v2414_v52 = vld [vmem:[%s3150_s1 + $0x50] sm:$0xff]  ;;  %v2421_v54 = vld [vmem:[%s3150_s1 + $0x88] sm:$0xff] }
  0x1b   : > { %v2431_v44 = vld [vmem:[%s3150_s1 + $0xd8] sm:$0xff]  ;;  %v2429_v55 = vld [vmem:[%s3150_s1 + $0xc8] sm:$0xff]  ;;  %v2420_v57 = vld [vmem:[%s3150_s1 + $0x80] sm:$0xff] }
  0x1c   : > { %v2415_v49 = vld [vmem:[%s3150_s1 + $0x58] sm:$0xff]  ;;  %v2413_v56 = vld [vmem:[%s3150_s1 + $0x48] sm:$0xff]  ;;  %v2428_v58 = vld [vmem:[%s3150_s1 + $0xc0] sm:$0xff] }
  0x1d   : > { %2547 = vmatpush.bf16.msra.mxu1 %v2407_v4  ;;  %2548 = vmatpush.bf16.msra.mxu2 %v2407_v4  ;;  %v1964_v59 = vld [vmem:[%s2683_s11 + $0xf0] sm:$0xf]  ;;  %v2356_v60 = vld [vmem:[%s2683_s11 + $0x100] sm:$0xf0]  ;;  %v1984_v8 = vld [vmem:[%s2683_s11 + $0x118] sm:$0xf] }
  0x1e   : > { %2549 = vmatpush.bf16.msra.mxu3 %v2407_v4  ;;  %1107 = vmatpush.bf16.msra.mxu0 %v2407_v4  ;;  %v2044_v61 = vld [vmem:[%s2683_s11 + $0x190] sm:$0xf]  ;;  %v2376_v62 = vld [vmem:[%s2683_s11 + $0x1a0] sm:$0xf0]  ;;  %v1965_v4 = vor.u32 %v2356_v60, %v1964_v59  ;;  %v2361_v9 = vld [vmem:[%s2683_s11 + $0x128] sm:$0xf0] }
  0x1f   : > { %v2124_v63 = vld [vmem:[%s2683_s11 + $0x230] sm:$0xf]  ;;  %v2396_v0 = vld [vmem:[%s2683_s11 + $0x240] sm:$0xf0]  ;;  %v2064_v10 = vld [vmem:[%s2683_s11 + $0x1b8] sm:$0xf] }
  0x20   : > { %v1884_v1 = vld [vmem:[%s2683_s11 + $0x50] sm:$0xf]  ;;  %v2336_v2 = vld [vmem:[%s2683_s11 + $0x60] sm:$0xf0]  ;;  %v2381_v11 = vld [vmem:[%s2683_s11 + $0x1c8] sm:$0xf0] }
  0x21   : > { %2550 = vmatpush.bf16.msra.mxu1 %v2406_v5  ;;  %2551 = vmatpush.bf16.msra.mxu2 %v2406_v5  ;;  %v2412_v3 = vld [vmem:[%s3150_s1 + $0x40] sm:$0xff]  ;;  %v2144_v12 = vld [vmem:[%s2683_s11 + $0x258] sm:$0xf]  ;;  %v2401_v13 = vld [vmem:[%s2683_s11 + $0x268] sm:$0xf0] }
  0x22   : > { %2552 = vmatpush.bf16.msra.mxu3 %v2406_v5  ;;  %1108 = vmatpush.bf16.msra.mxu0 %v2406_v5  ;;  %v2045_v5 = vor.u32 %v2376_v62, %v2044_v61  ;;  %v1904_v14 = vld [vmem:[%s2683_s11 + $0x78] sm:$0xf]  ;;  %v2341_v15 = vld [vmem:[%s2683_s11 + $0x88] sm:$0xf0]  ;;  %v1872_v34 = vld [vmem:[%s2683_s11 + $0x30] sm:$0xf] }
  0x23   : > { %v2332_v35 = vld [vmem:[%s2683_s11 + $0x40] sm:$0xf0]  ;;  %v2330_v36 = vld [vmem:[%s2683_s11 + $0x34] sm:$0xf]  ;;  %v1874_v37 = vld [vmem:[%s2683_s11 + $0x44] sm:$0xf0] }
  0x24   : > { %v1880_v38 = vld [vmem:[%s2683_s11 + $0x38] sm:$0xf]  ;;  %v2333_v39 = vld [vmem:[%s2683_s11 + $0x48] sm:$0xf0]  ;;  %v1873_v41 = vor.u32 %v2332_v35, %v1872_v34  ;;  %v2342_v59 = vld [vmem:[%s2683_s11 + $0x90] sm:$0xf0] }
  0x25   : > { %2553 = vmatpush.bf16.msra.mxu1 %v2405_v6  ;;  %2554 = vmatpush.bf16.msra.mxu2 %v2405_v6  ;;  %v2340_v60 = vld [vmem:[%s2683_s11 + $0x84] sm:$0xf]  ;;  %v1914_v61 = vld [vmem:[%s2683_s11 + $0x94] sm:$0xf0]  ;;  %v1920_v62 = vld [vmem:[%s2683_s11 + $0x88] sm:$0xf] }
  0x26   : > { %2555 = vmatpush.bf16.msra.mxu3 %v2405_v6  ;;  %1109 = vmatpush.bf16.msra.mxu0 %v2405_v6  ;;  %v2125_v6 = vor.u32 %v2396_v0, %v2124_v63  ;;  %v2343_v63 = vld [vmem:[%s2683_s11 + $0x98] sm:$0xf0] }
  0x29   : > { %2556 = vmatpush.bf16.msra.mxu1 %v2404_v7  ;;  %2557 = vmatpush.bf16.msra.mxu2 %v2404_v7 }
  0x2a   : > { %2558 = vmatpush.bf16.msra.mxu3 %v2404_v7  ;;  %1110 = vmatpush.bf16.msra.mxu0 %v2404_v7  ;;  %v1885_v7 = vor.u32 %v2336_v2, %v1884_v1  ;;  %v1917_v2 = vor.u32 %v2340_v60, %v1914_v61 }
  0x2c   : > { %1131 = vmatmul.bf16.vlgmr.msra.gmra.mxu1 %v1925_v18  ;;  %1151 = vmatmul.bf16.vlgmr.msra.gmra.mxu2 %v2005_v19  ;;  %v2145_v18 = vor.u32 %v2401_v13, %v2144_v12  ;;  %v1905_v19 = vor.u32 %v2341_v15, %v1904_v14 }
  0x2d   : > { %1281 = vmatpush.bf16.msrb.mxu2 %v2427_v16  ;;  %1171 = vmatmul.bf16.vlgmr.msra.gmra.mxu3 %v2085_v20  ;;  %v1985_v16 = vor.u32 %v2361_v9, %v1984_v8  ;;  %v2324_v20 = vld [vmem:[%s2683_s11 + $0x4] sm:$0xf]  ;;  %v2345_v8 = vld [vmem:[%s2683_s11 + $0xac] sm:$0xf]  ;;  %v1934_v9 = vld [vmem:[%s2683_s11 + $0xbc] sm:$0xf0] }
  0x2e   : > { %1370 = vmatpush.bf16.msrb.mxu3 %v2435_v17  ;;  %1111 = vmatmul.bf16.vlgmr.msra.gmra.mxu0 %v1845_v21  ;;  %v2065_v17 = vor.u32 %v2381_v11, %v2064_v10  ;;  %v1846_v21 = vld [vmem:[%s2683_s11 + $0x14] sm:$0xf0]  ;;  %v1940_v10 = vld [vmem:[%s2683_s11 + $0xb0] sm:$0xf]  ;;  %v2348_v11 = vld [vmem:[%s2683_s11 + $0xc0] sm:$0xf0]  ;;  %v1937_v15 = vor.u32 %v2345_v8, %v1934_v9 }
  0x2f   : > { %1192 = vmatpush.bf16.msrb.mxu1 %v2419_v22  ;;  %1463 = vmatpush.bf16.msrb.mxu0 %v2439_v23  ;;  %v1852_v22 = vld [vmem:[%s2683_s11 + $0x8] sm:$0xf]  ;;  %v2327_v23 = vld [vmem:[%s2683_s11 + $0x18] sm:$0xf0] }
  0x31   : > { %1282 = vmatpush.bf16.msrb.mxu2 %v2426_v24  ;;  %v2325_v24 = vld [vmem:[%s2683_s11 + $0xc] sm:$0xf] }
  0x32   : > { %1371 = vmatpush.bf16.msrb.mxu3 %v2434_v25  ;;  %v1854_v25 = vld [vmem:[%s2683_s11 + $0x1c] sm:$0xf0] }
  0x33   : > { %1193 = vmatpush.bf16.msrb.mxu1 %v2418_v26  ;;  %1464 = vmatpush.bf16.msrb.mxu0 %v2438_v27  ;;  %v1860_v26 = vld [vmem:[%s2683_s11 + $0x10] sm:$0xf]  ;;  %v2328_v27 = vld [vmem:[%s2683_s11 + $0x20] sm:$0xf0] }
  0x35   : > { %1283 = vmatpush.bf16.msrb.mxu2 %v2425_v28  ;;  %v1849_v28 = vor.u32 %v2324_v20, %v1846_v21 }
  0x36   : > { %1372 = vmatpush.bf16.msrb.mxu3 %v2433_v29  ;;  %v1853_v29 = vor.u32 %v2327_v23, %v1852_v22  ;;  %v2349_v22 = vld [vmem:[%s2683_s11 + $0xcc] sm:$0xf]  ;;  %v1946_v23 = vld [vmem:[%s2683_s11 + $0xdc] sm:$0xf0] }
  0x37   : > { %1194 = vmatpush.bf16.msrb.mxu1 %v2417_v30  ;;  %1465 = vmatpush.bf16.msrb.mxu0 %v2437_v31  ;;  %v1857_v30 = vor.u32 %v2325_v24, %v1854_v25  ;;  %v1861_v31 = vor.u32 %v2328_v27, %v1860_v26  ;;  %v1952_v24 = vld [vmem:[%s2683_s11 + $0xd0] sm:$0xf]  ;;  %v2352_v25 = vld [vmem:[%s2683_s11 + $0xe0] sm:$0xf0]  ;;  %v2350_v26 = vld [vmem:[%s2683_s11 + $0xd4] sm:$0xf] }
  0x38   : > { %v1954_v27 = vld [vmem:[%s2683_s11 + $0xe4] sm:$0xf0] }
  0x39   : > { %1284 = vmatpush.bf16.msrb.mxu2 %v2424_v32  ;;  %v2329_v32 = vld [vmem:[%s2683_s11 + $0x2c] sm:$0xf]  ;;  %v1957_v35 = vor.u32 %v2350_v26, %v1954_v27  ;;  %v2012_v26 = vld [vmem:[%s2683_s11 + $0x148] sm:$0xf]  ;;  %v2367_v27 = vld [vmem:[%s2683_s11 + $0x158] sm:$0xf0] }
  0x3a   : > { %1373 = vmatpush.bf16.msrb.mxu3 %v2432_v33  ;;  %v1866_v33 = vld [vmem:[%s2683_s11 + $0x3c] sm:$0xf0] }
  0x3b   : > { %1195 = vmatpush.bf16.msrb.mxu1 %v2416_v42  ;;  %1466 = vmatpush.bf16.msrb.mxu0 %v2436_v53  ;;  %v1869_v40 = vor.u32 %v2329_v32, %v1866_v33  ;;  %v1877_v42 = vor.u32 %v2330_v36, %v1874_v37  ;;  %v1949_v32 = vor.u32 %v2349_v22, %v1946_v23 }
  0x3c   : > { %1136 = vmatmul.bf16.gmra.mxu1 %v1945_v45  ;;  %1156 = vmatmul.bf16.gmra.mxu2 %v2025_v46  ;;  %v1886_v45 = vld [vmem:[%s2683_s11 + $0x64] sm:$0xf0]  ;;  %v1892_v46 = vld [vmem:[%s2683_s11 + $0x58] sm:$0xf]  ;;  %v1953_v33 = vor.u32 %v2352_v25, %v1952_v24  ;;  %v2364_v24 = vld [vmem:[%s2683_s11 + $0x144] sm:$0xf] }
  0x3d   : > { %1285 = vmatpush.bf16.msrb.mxu2 %v2423_v43  ;;  %1176 = vmatmul.bf16.gmra.mxu3 %v2105_v47  ;;  %v1881_v43 = vor.u32 %v2333_v39, %v1880_v38  ;;  %v2337_v47 = vld [vmem:[%s2683_s11 + $0x68] sm:$0xf0]  ;;  %v2006_v25 = vld [vmem:[%s2683_s11 + $0x154] sm:$0xf0] }
  0x3e   : > { %1374 = vmatpush.bf16.msrb.mxu3 %v2431_v44  ;;  %1116 = vmatmul.bf16.gmra.mxu0 %v1865_v48  ;;  %v2334_v44 = vld [vmem:[%s2683_s11 + $0x54] sm:$0xf]  ;;  %v2335_v48 = vld [vmem:[%s2683_s11 + $0x5c] sm:$0xf]  ;;  %v1893_v53 = vor.u32 %v2337_v47, %v1892_v46  ;;  %v1974_v47 = vld [vmem:[%s2683_s11 + $0x10c] sm:$0xf0] }
  0x3f   : > { %1196 = vmatpush.bf16.msrb.mxu1 %v2415_v49  ;;  %v1894_v49 = vld [vmem:[%s2683_s11 + $0x6c] sm:$0xf0]  ;;  %v2355_v46 = vld [vmem:[%s2683_s11 + $0xfc] sm:$0xf] }
  0x41   : > { %1286 = vmatpush.bf16.msrb.mxu2 %v2422_v50  ;;  %v1900_v50 = vld [vmem:[%s2683_s11 + $0x60] sm:$0xf] }
  0x42   : > { %1375 = vmatpush.bf16.msrb.mxu3 %v2430_v51  ;;  %v2338_v51 = vld [vmem:[%s2683_s11 + $0x70] sm:$0xf0] }
  0x43   : > { %1197 = vmatpush.bf16.msrb.mxu1 %v2414_v52  ;;  %v1889_v52 = vor.u32 %v2334_v44, %v1886_v45  ;;  %v1972_v44 = vld [vmem:[%s2683_s11 + $0xf8] sm:$0xf]  ;;  %v2357_v45 = vld [vmem:[%s2683_s11 + $0x108] sm:$0xf0] }
  0x45   : > { %1287 = vmatpush.bf16.msrb.mxu2 %v2421_v54  ;;  %v1897_v54 = vor.u32 %v2335_v48, %v1894_v49  ;;  %v1980_v48 = vld [vmem:[%s2683_s11 + $0x100] sm:$0xf]  ;;  %v2358_v49 = vld [vmem:[%s2683_s11 + $0x110] sm:$0xf0] }
  0x46   : > { %1376 = vmatpush.bf16.msrb.mxu3 %v2429_v55  ;;  %v1901_v55 = vor.u32 %v2338_v51, %v1900_v50 }
  0x47   : > { %1198 = vmatpush.bf16.msrb.mxu1 %v2413_v56  ;;  %v2339_v56 = vld [vmem:[%s2683_s11 + $0x7c] sm:$0xf] }
  0x49   : > { %1288 = vmatpush.bf16.msrb.mxu2 %v2420_v57  ;;  %v1906_v57 = vld [vmem:[%s2683_s11 + $0x8c] sm:$0xf0] }
  0x4a   : > { %1377 = vmatpush.bf16.msrb.mxu3 %v2428_v58  ;;  %v1912_v58 = vld [vmem:[%s2683_s11 + $0x80] sm:$0xf]  ;;  %v1909_v0 = vor.u32 %v2339_v56, %v1906_v57  ;;  %v1981_v56 = vor.u32 %v2358_v49, %v1980_v48 }
  0x4b   : > { %1199 = vmatpush.bf16.msrb.mxu1 %v2412_v3  ;;  %v1913_v1 = vor.u32 %v2342_v59, %v1912_v58  ;;  %v1921_v3 = vor.u32 %v2343_v63, %v1920_v62  ;;  %v2359_v62 = vld [vmem:[%s2683_s11 + $0x11c] sm:$0xf]  ;;  %v1986_v63 = vld [vmem:[%s2683_s11 + $0x12c] sm:$0xf0] }
  0x4c   : > { %1141 = vmatmul.bf16.gmra.mxu1 %v1965_v4  ;;  %1161 = vmatmul.bf16.gmra.mxu2 %v2045_v5  ;;  %v2344_v4 = vld [vmem:[%s2683_s11 + $0xa4] sm:$0xf]  ;;  %v1926_v5 = vld [vmem:[%s2683_s11 + $0xb4] sm:$0xf0]  ;;  %v1989_v8 = vor.u32 %v2359_v62, %v1986_v63  ;;  %v2953_v63 = vld [vmem:[%s3151_s2] ss:$0 sm:$0xff] }
  0x4d   : > { %1181 = vmatmul.bf16.gmra.mxu3 %v2125_v6  ;;  %v1932_v6 = vld [vmem:[%s2683_s11 + $0xa8] sm:$0xf]  ;;  %v1929_v12 = vor.u32 %v2344_v4, %v1926_v5  ;;  %v2363_v5 = vld [vmem:[%s2683_s11 + $0x138] sm:$0xf0] }
  0x4e   : > { %1121 = vmatmul.bf16.gmra.mxu0 %v1885_v7  ;;  %v2347_v7 = vld [vmem:[%s2683_s11 + $0xb8] sm:$0xf0]  ;;  %v2000_v4 = vld [vmem:[%s2683_s11 + $0x128] sm:$0xf] }
  0x4f   : > { %v1933_v13 = vor.u32 %v2347_v7, %v1932_v6 }
  0x5c   : > { %1146 = vmatmul.bf16.gmra.mxu1 %v1985_v16  ;;  %1166 = vmatmul.bf16.gmra.mxu2 %v2065_v17  ;;  %v1941_v16 = vor.u32 %v2348_v11, %v1940_v10 }
  0x5d   : > { %1186 = vmatmul.bf16.gmra.mxu3 %v2145_v18 }
  0x5e   : > { %1126 = vmatmul.bf16.gmra.mxu0 %v1905_v19 }
  0x6c   : > { %1200 = vmatmul.bf16.vlgmr.msrb.gmra.mxu1 %v1849_v28  ;;  %1289 = vmatmul.bf16.vlgmr.msrb.gmra.mxu2 %v1853_v29  ;;  %v1960_v28 = vld [vmem:[%s2683_s11 + $0xd8] sm:$0xf]  ;;  %v2353_v29 = vld [vmem:[%s2683_s11 + $0xe8] sm:$0xf0] }
  0x6d   : > { %1378 = vmatmul.bf16.vlgmr.msrb.gmra.mxu3 %v1857_v30  ;;  %v1961_v36 = vor.u32 %v2353_v29, %v1960_v28  ;;  %v2365_v28 = vld [vmem:[%s2683_s11 + $0x14c] sm:$0xf]  ;;  %v2014_v29 = vld [vmem:[%s2683_s11 + $0x15c] sm:$0xf0] }
  0x6e   : > { %2306 = vmatmul.msk.bf16.vlgmr.msrb.gmra.mxu0 %vm1054_vm0, %v1861_v31 }
  0x7c   : > { %1205 = vmatmul.bf16.gmra.mxu1 %v1869_v40  ;;  %1294 = vmatmul.bf16.gmra.mxu2 %v1873_v41 }
  0x7d   : > { %1383 = vmatmul.bf16.gmra.mxu3 %v1877_v42  ;;  %v2354_v42 = vld [vmem:[%s2683_s11 + $0xf4] sm:$0xf] }
  0x7e   : > { %2307 = vmatmul.msk.bf16.gmra.mxu0 %vm1054_vm0, %v1881_v43  ;;  %v1966_v43 = vld [vmem:[%s2683_s11 + $0x104] sm:$0xf0] }
  0x8c   : > { %1210 = vmatmul.bf16.gmra.mxu1 %v1889_v52  ;;  %1299 = vmatmul.bf16.gmra.mxu2 %v1893_v53  ;;  %v1969_v52 = vor.u32 %v2354_v42, %v1966_v43  ;;  %v1973_v53 = vor.u32 %v2357_v45, %v1972_v44  ;;  %v2009_v42 = vor.u32 %v2364_v24, %v2006_v25 }
  0x8d   : > { %1388 = vmatmul.bf16.gmra.mxu3 %v1897_v54  ;;  %v2013_v43 = vor.u32 %v2367_v27, %v2012_v26  ;;  %v2017_v45 = vor.u32 %v2365_v28, %v2014_v29 }
  0x8e   : > { %2308 = vmatmul.msk.bf16.gmra.mxu0 %vm1054_vm0, %v1901_v55  ;;  %v1977_v55 = vor.u32 %v2355_v46, %v1974_v47 }
  0x9c   : > { %1215 = vmatmul.bf16.gmra.mxu1 %v1909_v0  ;;  %1304 = vmatmul.bf16.gmra.mxu2 %v1913_v1  ;;  %v1992_v0 = vld [vmem:[%s2683_s11 + $0x120] sm:$0xf]  ;;  %v2362_v1 = vld [vmem:[%s2683_s11 + $0x130] sm:$0xf0] }
  0x9d   : > { %1393 = vmatmul.bf16.gmra.mxu3 %v1917_v2  ;;  %v2360_v2 = vld [vmem:[%s2683_s11 + $0x124] sm:$0xf]  ;;  %v1993_v9 = vor.u32 %v2362_v1, %v1992_v0  ;;  %v2369_v0 = vld [vmem:[%s2683_s11 + $0x16c] sm:$0xf]  ;;  %v2026_v1 = vld [vmem:[%s2683_s11 + $0x17c] sm:$0xf0] }
  0x9e   : > { %2309 = vmatmul.msk.bf16.gmra.mxu0 %vm1054_vm0, %v1921_v3  ;;  %v1994_v3 = vld [vmem:[%s2683_s11 + $0x134] sm:$0xf0]  ;;  %v2029_v26 = vor.u32 %v2369_v0, %v2026_v1 }
  0x9f   : > { %v1997_v11 = vor.u32 %v2360_v2, %v1994_v3  ;;  %v2032_v2 = vld [vmem:[%s2683_s11 + $0x170] sm:$0xf]  ;;  %v2372_v3 = vld [vmem:[%s2683_s11 + $0x180] sm:$0xf0] }
  0xa0   : > { %v2033_v27 = vor.u32 %v2372_v3, %v2032_v2  ;;  %v2374_v2 = vld [vmem:[%s2683_s11 + $0x194] sm:$0xf]  ;;  %v2046_v3 = vld [vmem:[%s2683_s11 + $0x1a4] sm:$0xf0] }
  0xa9   : > { %v2848_v14 = vpop.f32.mrf.mxu1 }
  0xab   : > { %v2850_v17 = vpop.f32.mrf.mxu0 }
  0xac   : > { %1220 = vmatmul.bf16.gmra.mxu1 %v1929_v12  ;;  %1309 = vmatmul.bf16.gmra.mxu2 %v1933_v13  ;;  %v2001_v12 = vor.u32 %v2363_v5, %v2000_v4  ;;  %v2370_v4 = vld [vmem:[%s2683_s11 + $0x174] sm:$0xf] }
  0xad   : > { %1398 = vmatmul.bf16.gmra.mxu3 %v1937_v15 }
  0xae   : > { %2310 = vmatmul.msk.bf16.gmra.mxu0 %vm1054_vm0, %v1941_v16 }
  0xaf   : > { %v2853_v18 = vpop.f32.mrf.mxu2 }
  0xb0   : > { %v2855_v19 = vpop.f32.mrf.mxu3 }
  0xb1   : > { %v2857_v20 = vpop.f32.mrf.mxu1 }
  0xb3   : > { %v2859_v21 = vpop.f32.mrf.mxu0 }
  0xb7   : > { %v2869_v30 = vpop.f32.mrf.mxu2 }
  0xb8   : > { %v2871_v31 = vpop.f32.mrf.mxu3 }
  0xb9   : > { %v2873_v34 = vpop.f32.mrf.mxu1 }
  0xbb   : > { %v2875_v37 = vpop.f32.mrf.mxu0 }
  0xbc   : > { %1225 = vmatmul.bf16.gmra.mxu1 %v1949_v32  ;;  %1314 = vmatmul.bf16.gmra.mxu2 %v1953_v33  ;;  %v2020_v32 = vld [vmem:[%s2683_s11 + $0x150] sm:$0xf]  ;;  %v2368_v33 = vld [vmem:[%s2683_s11 + $0x160] sm:$0xf0] }
  0xbd   : > { %1403 = vmatmul.bf16.gmra.mxu3 %v1957_v35  ;;  %v2021_v46 = vor.u32 %v2368_v33, %v2020_v32 }
  0xbe   : > { %2311 = vmatmul.msk.bf16.gmra.mxu0 %vm1054_vm0, %v1961_v36 }
  0xbf   : > { %v2878_v38 = vpop.f32.mrf.mxu2 }
  0xc0   : > { %v2880_v39 = vpop.f32.mrf.mxu3 }
  0xc1   : > { %v2882_v40 = vpop.f32.mrf.mxu1 }
  0xc3   : > { %v2884_v41 = vpop.f32.mrf.mxu0 }
  0xc7   : > { %v2894_v50 = vpop.f32.mrf.mxu2 }
  0xc8   : > { %v2896_v51 = vpop.f32.mrf.mxu3 }
  0xc9   : > { %v2898_v54 = vpop.f32.mrf.mxu1 }
  0xcb   : > { %v2900_v57 = vpop.f32.mrf.mxu0 }
  0xcc   : > { %1230 = vmatmul.bf16.gmra.mxu1 %v1969_v52  ;;  %1319 = vmatmul.bf16.gmra.mxu2 %v1973_v53 }
  0xcd   : > { %1408 = vmatmul.bf16.gmra.mxu3 %v1977_v55 }
  0xce   : > { %2312 = vmatmul.msk.bf16.gmra.mxu0 %vm1054_vm0, %v1981_v56 }
  0xcf   : > { %v2903_v58 = vpop.f32.mrf.mxu2 }
  0xd0   : > { %v2905_v59 = vpop.f32.mrf.mxu3 }
  0xd1   : > { %v2907_v60 = vpop.f32.mrf.mxu1 }
  0xd3   : > { %v2909_v61 = vpop.f32.mrf.mxu0 }
  0xd7   : > { %v2919_v6 = vpop.f32.mrf.mxu2 }
  0xd8   : > { %v2921_v7 = vpop.f32.mrf.mxu3 }
  0xd9   : > { %v2923_v10 = vpop.f32.mrf.mxu1 }
  0xdb   : > { %v2925_v13 = vpop.f32.mrf.mxu0 }
  0xdc   : > { %1235 = vmatmul.bf16.gmra.mxu1 %v1989_v8  ;;  %1324 = vmatmul.bf16.gmra.mxu2 %v1993_v9  ;;  %v2034_v8 = vld [vmem:[%s2683_s11 + $0x184] sm:$0xf0]  ;;  %v2040_v9 = vld [vmem:[%s2683_s11 + $0x178] sm:$0xf] }
  0xdd   : > { %1413 = vmatmul.bf16.gmra.mxu3 %v1997_v11  ;;  %v2373_v11 = vld [vmem:[%s2683_s11 + $0x188] sm:$0xf0]  ;;  %v2037_v29 = vor.u32 %v2370_v4, %v2034_v8  ;;  %v2052_v4 = vld [vmem:[%s2683_s11 + $0x198] sm:$0xf] }
  0xde   : > { %2313 = vmatmul.msk.bf16.gmra.mxu0 %vm1054_vm0, %v2001_v12  ;;  %v2041_v32 = vor.u32 %v2373_v11, %v2040_v9  ;;  %v2054_v11 = vld [vmem:[%s2683_s11 + $0x1ac] sm:$0xf0] }
  0xdf   : > { %v2928_v15 = vpop.f32.mrf.mxu2 }
  0xe0   : > { %v2930_v16 = vpop.f32.mrf.mxu3 }
  0xe1   : > { %v2932_v22 = vpop.f32.mrf.mxu1 }
  0xe3   : > { %v2934_v23 = vpop.f32.mrf.mxu0 }
  0xe7   : > { %v2944_v35 = vpop.f32.mrf.mxu2 }
  0xe8   : > { %v2946_v36 = vpop.f32.mrf.mxu3 }
  0xe9   : > { %v1201_v44 = vpop.f32.mrf.mxu1 }
  0xea   : > { %v1202_v48 = vadd.f32 %v1201_v44, %v2850_v17 }
  0xeb   : > { %v1468_v47 = vpop.f32.mrf.mxu0 }
  0xec   : > { %1240 = vmatmul.bf16.gmra.mxu1 %v2009_v42  ;;  %1329 = vmatmul.bf16.gmra.mxu2 %v2013_v43  ;;  %v2968_v42 = vld [vmem:[%s3152_s3] ss:$0 sm:$0xff] }
  0xed   : > { %1418 = vmatmul.bf16.gmra.mxu3 %v2017_v45 }
  0xee   : > { %2314 = vmatmul.msk.bf16.gmra.mxu0 %vm1054_vm0, %v2021_v46 }
  0xef   : > { %v1290_v49 = vpop.f32.mrf.mxu2 }
  0xf0   : > { %v1291_v52 = vadd.f32 %v1290_v49, %v1202_v48  ;;  %v1379_v53 = vpop.f32.mrf.mxu3 }
  0xf1   : > { %v1203_v55 = vpop.f32.mrf.mxu1 }
  0xf2   : > { %v1380_v56 = vadd.f32 %v1379_v53, %v1291_v52  ;;  %v1204_v17 = vadd.f32 %v1203_v55, %v2859_v21 }
  0xf3   : > { %v1470_v62 = vpop.f32.mrf.mxu0 }
  0xf4   : > { %v1469_v5 = vadd.f32 %v1468_v47, %v1380_v56 }
  0xf6   : > { %v1552_v33 = vmul.f32 %v2953_v63, %v1469_v5  ;;  %v2377_v5 = vld [vmem:[%s2683_s11 + $0x1a8] sm:$0xf0] }
  0xf7   : > { %v1292_v12 = vpop.f32.mrf.mxu2 }
  0xf8   : > { %v1293_v24 = vadd.f32 %v1292_v12, %v1204_v17  ;;  %v1381_v25 = vpop.f32.mrf.mxu3  ;;  %v1588_v45 = vadd.f32 %v2968_v42, %v1552_v33  ;;  %v2375_v17 = vld [vmem:[%s2683_s11 + $0x19c] sm:$0xf]  ;;  %v2060_v12 = vld [vmem:[%s2683_s11 + $0x1a0] sm:$0xf] }
  0xf9   : > { %v1206_v28 = vpop.f32.mrf.mxu1  ;;  %v2057_v33 = vor.u32 %v2375_v17, %v2054_v11  ;;  %v2382_v17 = vld [vmem:[%s2683_s11 + $0x1d0] sm:$0xf0] }
  0xfa   : > { %v1382_v21 = vadd.f32 %v1381_v25, %v1293_v24  ;;  %v1207_v47 = vadd.f32 %v1206_v28, %v2875_v37  ;;  %v1620_v56 = vmax.f32 %v1588_v45, 0.0  ;;  %v2378_v24 = vld [vmem:[%s2683_s11 + $0x1b0] sm:$0xf0]  ;;  %v2049_v28 = vor.u32 %v2374_v2, %v2046_v3  ;;  %v2379_v3 = vld [vmem:[%s2683_s11 + $0x1bc] sm:$0xf] }
  0xfb   : > { %v1473_v43 = vpop.f32.mrf.mxu0 }
  0xfc   : > { %v1471_v44 = vadd.f32 %v1470_v62, %v1382_v21  ;;  %1245 = vmatmul.bf16.gmra.mxu1 %v2029_v26  ;;  %1334 = vmatmul.bf16.gmra.mxu2 %v2033_v27  ;;  %v2061_v21 = vor.u32 %v2378_v24, %v2060_v12  ;;  %v2080_v12 = vld [vmem:[%s2683_s11 + $0x1c8] sm:$0xf]  ;;  %v2383_v24 = vld [vmem:[%s2683_s11 + $0x1d8] sm:$0xf0] }
  0xfd   : > { %1423 = vmatmul.bf16.gmra.mxu3 %v2037_v29  ;;  %v2053_v29 = vor.u32 %v2377_v5, %v2052_v4  ;;  %v2066_v4 = vld [vmem:[%s2683_s11 + $0x1cc] sm:$0xf0]  ;;  %v2072_v5 = vld [vmem:[%s2683_s11 + $0x1c0] sm:$0xf] }
  0xfe   : > { %2315 = vmatmul.msk.bf16.gmra.mxu0 %vm1054_vm0, %v2041_v32  ;;  %v1553_v46 = vmul.f32 %v2953_v63, %v1471_v44 }
  0xff   : > { %v1295_v48 = vpop.f32.mrf.mxu2 }
 0x100   : > { %v1589_v49 = vadd.f32 %v2968_v42, %v1553_v46  ;;  %v1296_v52 = vadd.f32 %v1295_v48, %v1207_v47  ;;  %v1384_v53 = vpop.f32.mrf.mxu3 }
 0x101   : > { %v1208_v55 = vpop.f32.mrf.mxu1 }
 0x102   : > { %v1621_v62 = vmax.f32 %v1589_v49, 0.0  ;;  %v1385_v0 = vadd.f32 %v1384_v53, %v1296_v52  ;;  %v1209_v9 = vadd.f32 %v1208_v55, %v2884_v41 }
 0x103   : > { %v1475_v1 = vpop.f32.mrf.mxu0 }
 0x104   : > { %v2443_v37 = vpack.c.bf16 %v1621_v62, %v1620_v56  ;;  %v1474_v8 = vadd.f32 %v1473_v43, %v1385_v0 }
 0x106   : > { %2444 = vst [vmem:[%s2979_s14] sm:$0xff] %v2443_v37   ;;  %v1554_v44 = vmul.f32 %v2953_v63, %v1474_v8  ;;  %v2074_v8 = vld [vmem:[%s2683_s11 + $0x1d4] sm:$0xf0] }
 0x107   : > { %v1297_v25 = vpop.f32.mrf.mxu2 }
 0x108   : > { %v1298_v26 = vadd.f32 %v1297_v25, %v1209_v9  ;;  %v1386_v27 = vpop.f32.mrf.mxu3  ;;  %v1590_v41 = vadd.f32 %v2968_v42, %v1554_v44 }
 0x109   : > { %v1211_v32 = vpop.f32.mrf.mxu1 }
 0x10a   : > { %v1387_v45 = vadd.f32 %v1386_v27, %v1298_v26  ;;  %v1212_v48 = vadd.f32 %v1211_v32, %v2900_v57  ;;  %v1622_v62 = vmax.f32 %v1590_v41, 0.0  ;;  %v2380_v57 = vld [vmem:[%s2683_s11 + $0x1c4] sm:$0xf] }
 0x10b   : > { %v1478_v46 = vpop.f32.mrf.mxu0 }
 0x10c   : > { %v1476_v47 = vadd.f32 %v1475_v1, %v1387_v45  ;;  %1250 = vmatmul.bf16.gmra.mxu1 %v2049_v28  ;;  %1339 = vmatmul.bf16.gmra.mxu2 %v2053_v29  ;;  %v2069_v28 = vor.u32 %v2379_v3, %v2066_v4  ;;  %v2073_v29 = vor.u32 %v2382_v17, %v2072_v5  ;;  %v2086_v3 = vld [vmem:[%s2683_s11 + $0x1f4] sm:$0xf0]  ;;  %v2092_v4 = vld [vmem:[%s2683_s11 + $0x1e8] sm:$0xf]  ;;  %v2387_v5 = vld [vmem:[%s2683_s11 + $0x1f8] sm:$0xf0] }
 0x10d   : > { %1428 = vmatmul.bf16.gmra.mxu3 %v2057_v33  ;;  %v2077_v33 = vor.u32 %v2380_v57, %v2074_v8  ;;  %v2094_v17 = vld [vmem:[%s2683_s11 + $0x1fc] sm:$0xf0] }
 0x10e   : > { %2316 = vmatmul.msk.bf16.gmra.mxu0 %vm1054_vm0, %v2061_v21  ;;  %v1555_v43 = vmul.f32 %v2953_v63, %v1476_v47  ;;  %v2081_v21 = vor.u32 %v2383_v24, %v2080_v12 }
 0x10f   : > { %v1300_v49 = vpop.f32.mrf.mxu2 }
 0x110   : > { %v1591_v52 = vadd.f32 %v2968_v42, %v1555_v43  ;;  %v1301_v53 = vadd.f32 %v1300_v49, %v1212_v48  ;;  %v1389_v55 = vpop.f32.mrf.mxu3 }
 0x111   : > { %v1213_v56 = vpop.f32.mrf.mxu1 }
 0x112   : > { %v1623_v0 = vmax.f32 %v1591_v52, 0.0  ;;  %v1390_v1 = vadd.f32 %v1389_v55, %v1301_v53  ;;  %v1214_v11 = vadd.f32 %v1213_v56, %v2909_v61 }
 0x113   : > { %v1480_v37 = vpop.f32.mrf.mxu0 }
 0x114   : > { %v2448_v2 = vpack.c.bf16 %v1623_v0, %v1622_v62  ;;  %v1479_v9 = vadd.f32 %v1478_v46, %v1390_v1 }
 0x116   : > { %2520 = vst [vmem:[%s2979_s14 + $0x8] sm:$0xff] %v2448_v2   ;;  %v1556_v44 = vmul.f32 %v2953_v63, %v1479_v9  ;;  %v2384_v2 = vld [vmem:[%s2683_s11 + $0x1e4] sm:$0xf]  ;;  %v2100_v9 = vld [vmem:[%s2683_s11 + $0x1f0] sm:$0xf] }
 0x117   : > { %v1302_v25 = vpop.f32.mrf.mxu2 }
 0x118   : > { %v1303_v26 = vadd.f32 %v1302_v25, %v1214_v11  ;;  %v1391_v27 = vpop.f32.mrf.mxu3  ;;  %v1592_v61 = vadd.f32 %v2968_v42, %v1556_v44  ;;  %v2388_v11 = vld [vmem:[%s2683_s11 + $0x200] sm:$0xf0] }
 0x119   : > { %v1216_v32 = vpop.f32.mrf.mxu1 }
 0x11a   : > { %v1392_v45 = vadd.f32 %v1391_v27, %v1303_v26  ;;  %v1217_v43 = vadd.f32 %v1216_v32, %v2925_v13  ;;  %v1624_v56 = vmax.f32 %v1592_v61, 0.0  ;;  %v2385_v13 = vld [vmem:[%s2683_s11 + $0x1ec] sm:$0xf]  ;;  %v2089_v26 = vor.u32 %v2384_v2, %v2086_v3  ;;  %v2392_v2 = vld [vmem:[%s2683_s11 + $0x220] sm:$0xf0] }
 0x11b   : > { %v1483_v47 = vpop.f32.mrf.mxu0  ;;  %v2093_v27 = vor.u32 %v2387_v5, %v2092_v4  ;;  %v2101_v32 = vor.u32 %v2388_v11, %v2100_v9  ;;  %v2114_v3 = vld [vmem:[%s2683_s11 + $0x224] sm:$0xf0] }
 0x11c   : > { %v1481_v41 = vadd.f32 %v1480_v37, %v1392_v45  ;;  %1255 = vmatmul.bf16.gmra.mxu1 %v2069_v28  ;;  %1344 = vmatmul.bf16.gmra.mxu2 %v2073_v29  ;;  %v2097_v29 = vor.u32 %v2385_v13, %v2094_v17  ;;  %v2120_v13 = vld [vmem:[%s2683_s11 + $0x218] sm:$0xf]  ;;  %v2393_v17 = vld [vmem:[%s2683_s11 + $0x228] sm:$0xf0] }
 0x11d   : > { %1433 = vmatmul.bf16.gmra.mxu3 %v2077_v33 }
 0x11e   : > { %2317 = vmatmul.msk.bf16.gmra.mxu0 %vm1054_vm0, %v2081_v21  ;;  %v1557_v46 = vmul.f32 %v2953_v63, %v1481_v41 }
 0x11f   : > { %v1305_v48 = vpop.f32.mrf.mxu2 }
 0x120   : > { %v1593_v49 = vadd.f32 %v2968_v42, %v1557_v46  ;;  %v1306_v52 = vadd.f32 %v1305_v48, %v1217_v43  ;;  %v1394_v53 = vpop.f32.mrf.mxu3 }
 0x121   : > { %v1218_v55 = vpop.f32.mrf.mxu1 }
 0x122   : > { %v1625_v62 = vmax.f32 %v1593_v49, 0.0  ;;  %v1395_v0 = vadd.f32 %v1394_v53, %v1306_v52  ;;  %v1219_v8 = vadd.f32 %v1218_v55, %v2934_v23 }
 0x123   : > { %v1485_v1 = vpop.f32.mrf.mxu0 }
 0x124   : > { %v2453_v37 = vpack.c.bf16 %v1625_v62, %v1624_v56  ;;  %v1484_v57 = vadd.f32 %v1483_v47, %v1395_v0  ;;  %v2389_v0 = vld [vmem:[%s2683_s11 + $0x20c] sm:$0xf] }
 0x126   : > { %2521 = vst [vmem:[%s2979_s14 + $0x10] sm:$0xff] %v2453_v37   ;;  %v1558_v33 = vmul.f32 %v2953_v63, %v1484_v57  ;;  %v2112_v37 = vld [vmem:[%s2683_s11 + $0x210] sm:$0xf] }
 0x127   : > { %v1307_v12 = vpop.f32.mrf.mxu2 }
 0x128   : > { %v1308_v24 = vadd.f32 %v1307_v12, %v1219_v8  ;;  %v1396_v25 = vpop.f32.mrf.mxu3  ;;  %v1594_v23 = vadd.f32 %v2968_v42, %v1558_v33  ;;  %v2113_v12 = vor.u32 %v2392_v2, %v2112_v37  ;;  %v2140_v37 = vld [vmem:[%s2683_s11 + $0x240] sm:$0xf]  ;;  %v2398_v2 = vld [vmem:[%s2683_s11 + $0x250] sm:$0xf0] }
 0x129   : > { %v1221_v28 = vpop.f32.mrf.mxu1 }
 0x12a   : > { %v1397_v21 = vadd.f32 %v1396_v25, %v1308_v24  ;;  %v1222_v41 = vadd.f32 %v1221_v28, %v2848_v14  ;;  %v1626_v52 = vmax.f32 %v1594_v23, 0.0  ;;  %v2390_v14 = vld [vmem:[%s2683_s11 + $0x214] sm:$0xf] }
 0x12b   : > { %v1488_v44 = vpop.f32.mrf.mxu0  ;;  %v2117_v25 = vor.u32 %v2390_v14, %v2114_v3 }
 0x12c   : > { %v1486_v45 = vadd.f32 %v1485_v1, %v1397_v21  ;;  %1260 = vmatmul.bf16.gmra.mxu1 %v2089_v26  ;;  %1349 = vmatmul.bf16.gmra.mxu2 %v2093_v27  ;;  %v2106_v1 = vld [vmem:[%s2683_s11 + $0x21c] sm:$0xf0]  ;;  %v2121_v26 = vor.u32 %v2393_v17, %v2120_v13 }
 0x12d   : > { %1438 = vmatmul.bf16.gmra.mxu3 %v2097_v29  ;;  %v2109_v11 = vor.u32 %v2389_v0, %v2106_v1 }
 0x12e   : > { %2318 = vmatmul.msk.bf16.gmra.mxu0 %vm1054_vm0, %v2101_v32  ;;  %v1559_v47 = vmul.f32 %v2953_v63, %v1486_v45 }
 0x12f   : > { %v1310_v61 = vpop.f32.mrf.mxu2 }
 0x130   : > { %v1595_v46 = vadd.f32 %v2968_v42, %v1559_v47  ;;  %v1311_v43 = vadd.f32 %v1310_v61, %v1222_v41  ;;  %v1399_v48 = vpop.f32.mrf.mxu3 }
 0x131   : > { %v1223_v49 = vpop.f32.mrf.mxu1 }
 0x132   : > { %v1627_v53 = vmax.f32 %v1595_v46, 0.0  ;;  %v1400_v55 = vadd.f32 %v1399_v48, %v1311_v43  ;;  %v1224_v5 = vadd.f32 %v1223_v49, %v2857_v20 }
 0x133   : > { %v1490_v56 = vpop.f32.mrf.mxu0 }
 0x134   : > { %v2458_v62 = vpack.c.bf16 %v1627_v53, %v1626_v52  ;;  %v1489_v4 = vadd.f32 %v1488_v44, %v1400_v55  ;;  %v2394_v52 = vld [vmem:[%s2683_s11 + $0x234] sm:$0xf]  ;;  %v2126_v53 = vld [vmem:[%s2683_s11 + $0x244] sm:$0xf0]  ;;  %v2132_v55 = vld [vmem:[%s2683_s11 + $0x238] sm:$0xf] }
 0x136   : > { %2522 = vst [vmem:[%s2979_s14 + $0x18] sm:$0xff] %v2458_v62   ;;  %v1560_v27 = vmul.f32 %v2953_v63, %v1489_v4  ;;  %v2134_v62 = vld [vmem:[%s2683_s11 + $0x24c] sm:$0xf0] }
 0x137   : > { %v1312_v57 = vpop.f32.mrf.mxu2 }
 0x138   : > { %v1313_v8 = vadd.f32 %v1312_v57, %v1224_v5  ;;  %v1401_v9 = vpop.f32.mrf.mxu3  ;;  %v1596_v20 = vadd.f32 %v2968_v42, %v1560_v27  ;;  %v2129_v5 = vor.u32 %v2394_v52, %v2126_v53  ;;  %v2160_v52 = vld [vmem:[%s2683_s11 + $0x268] sm:$0xf]  ;;  %v2403_v53 = vld [vmem:[%s2683_s11 + $0x278] sm:$0xf0] }
 0x139   : > { %v1226_v24 = vpop.f32.mrf.mxu1 }
 0x13a   : > { %v1402_v28 = vadd.f32 %v1401_v9, %v1313_v8  ;;  %v1227_v21 = vadd.f32 %v1226_v24, %v2873_v34  ;;  %v1628_v61 = vmax.f32 %v1596_v20, 0.0  ;;  %v2395_v34 = vld [vmem:[%s2683_s11 + $0x23c] sm:$0xf]  ;;  %v2141_v8 = vor.u32 %v2398_v2, %v2140_v37 }
 0x13b   : > { %v1493_v29 = vpop.f32.mrf.mxu0  ;;  %v2137_v57 = vor.u32 %v2395_v34, %v2134_v62  ;;  %v2161_v2 = vor.u32 %v2403_v53, %v2160_v52 }
 0x13c   : > { %v1491_v32 = vadd.f32 %v1490_v56, %v1402_v28  ;;  %1265 = vmatmul.bf16.gmra.mxu1 %v2109_v11  ;;  %1354 = vmatmul.bf16.gmra.mxu2 %v2113_v12  ;;  %v2397_v56 = vld [vmem:[%s2683_s11 + $0x248] sm:$0xf0] }
 0x13d   : > { %1443 = vmatmul.bf16.gmra.mxu3 %v2117_v25  ;;  %v2133_v13 = vor.u32 %v2397_v56, %v2132_v55 }
 0x13e   : > { %2319 = vmatmul.msk.bf16.gmra.mxu0 %vm1054_vm0, %v2121_v26  ;;  %v1561_v33 = vmul.f32 %v2953_v63, %v1491_v32 }
 0x13f   : > { %v1315_v44 = vpop.f32.mrf.mxu2 }
 0x140   : > { %v1597_v45 = vadd.f32 %v2968_v42, %v1561_v33  ;;  %v1316_v23 = vadd.f32 %v1315_v44, %v1227_v21  ;;  %v1404_v47 = vpop.f32.mrf.mxu3 }
 0x141   : > { %v1228_v41 = vpop.f32.mrf.mxu1 }
 0x142   : > { %v1629_v46 = vmax.f32 %v1597_v45, 0.0  ;;  %v1405_v43 = vadd.f32 %v1404_v47, %v1316_v23  ;;  %v1229_v1 = vadd.f32 %v1228_v41, %v2882_v40  ;;  %v2399_v47 = vld [vmem:[%s2683_s11 + $0x25c] sm:$0xf]  ;;  %v2146_v41 = vld [vmem:[%s2683_s11 + $0x26c] sm:$0xf0] }
 0x143   : > { %v1495_v48 = vpop.f32.mrf.mxu0  ;;  %v2149_v62 = vor.u32 %v2399_v47, %v2146_v41 }
 0x144   : > { %v2463_v49 = vpack.c.bf16 %v1629_v46, %v1628_v61  ;;  %v1494_v0 = vadd.f32 %v1493_v29, %v1405_v43  ;;  %v2152_v61 = vld [vmem:[%s2683_s11 + $0x260] sm:$0xf]  ;;  %v2402_v46 = vld [vmem:[%s2683_s11 + $0x270] sm:$0xf0]  ;;  %v2154_v43 = vld [vmem:[%s2683_s11 + $0x274] sm:$0xf0] }
 0x146   : > { %2523 = vst [vmem:[%s2979_s14 + $0x20] sm:$0xff] %v2463_v49   ;;  %v1562_v9 = vmul.f32 %v2953_v63, %v1494_v0  ;;  %v2153_v0 = vor.u32 %v2402_v46, %v2152_v61 }
 0x147   : > { %v1317_v14 = vpop.f32.mrf.mxu2 }
 0x148   : > { %v1318_v3 = vadd.f32 %v1317_v14, %v1229_v1  ;;  %v1406_v4 = vpop.f32.mrf.mxu3  ;;  %v1598_v40 = vadd.f32 %v2968_v42, %v1562_v9 }
 0x149   : > { %v1231_v17 = vpop.f32.mrf.mxu1 }
 0x14a   : > { %v1407_v11 = vadd.f32 %v1406_v4, %v1318_v3  ;;  %v1232_v26 = vadd.f32 %v1231_v17, %v2898_v54  ;;  %v1630_v33 = vmax.f32 %v1598_v40, 0.0  ;;  %v2400_v54 = vld [vmem:[%s2683_s11 + $0x264] sm:$0xf] }
 0x14b   : > { %v1498_v12 = vpop.f32.mrf.mxu0  ;;  %v2157_v37 = vor.u32 %v2400_v54, %v2154_v43 }
 0x14c   : > { %v1496_v24 = vadd.f32 %v1495_v48, %v1407_v11  ;;  %1270 = vmatmul.bf16.gmra.mxu1 %v2129_v5  ;;  %1359 = vmatmul.bf16.gmra.mxu2 %v2133_v13 }
 0x14d   : > { %1448 = vmatmul.bf16.gmra.mxu3 %v2137_v57 }
 0x14e   : > { %2320 = vmatmul.msk.bf16.gmra.mxu0 %vm1054_vm0, %v2141_v8  ;;  %v1563_v25 = vmul.f32 %v2953_v63, %v1496_v24 }
 0x14f   : > { %v1320_v27 = vpop.f32.mrf.mxu2 }
 0x150   : > { %v1599_v28 = vadd.f32 %v2968_v42, %v1563_v25  ;;  %v1321_v29 = vadd.f32 %v1320_v27, %v1232_v26  ;;  %v1409_v32 = vpop.f32.mrf.mxu3 }
 0x151   : > { %v1233_v20 = vpop.f32.mrf.mxu1 }
 0x152   : > { %v1631_v21 = vmax.f32 %v1599_v28, 0.0  ;;  %v1410_v44 = vadd.f32 %v1409_v32, %v1321_v29  ;;  %v1234_v49 = vadd.f32 %v1233_v20, %v2907_v60 }
 0x153   : > { %v1500_v45 = vpop.f32.mrf.mxu0 }
 0x154   : > { %v2468_v23 = vpack.c.bf16 %v1631_v21, %v1630_v33  ;;  %v1499_v48 = vadd.f32 %v1498_v12, %v1410_v44 }
 0x156   : > { %2524 = vst [vmem:[%s2979_s14 + $0x28] sm:$0xff] %v2468_v23   ;;  %v1564_v14 = vmul.f32 %v2953_v63, %v1499_v48 }
 0x157   : > { %v1322_v55 = vpop.f32.mrf.mxu2 }
 0x158   : > { %v1323_v56 = vadd.f32 %v1322_v55, %v1234_v49  ;;  %v1411_v34 = vpop.f32.mrf.mxu3  ;;  %v1600_v60 = vadd.f32 %v2968_v42, %v1564_v14 }
 0x159   : > { %v1236_v1 = vpop.f32.mrf.mxu1 }
 0x15a   : > { %v1412_v3 = vadd.f32 %v1411_v34, %v1323_v56  ;;  %v1237_v17 = vadd.f32 %v1236_v1, %v2923_v10  ;;  %v1632_v24 = vmax.f32 %v1600_v60, 0.0 }
 0x15b   : > { %v1503_v4 = vpop.f32.mrf.mxu0 }
 0x15c   : > { %v1501_v5 = vadd.f32 %v1500_v45, %v1412_v3  ;;  %1275 = vmatmul.bf16.gmra.mxu1 %v2149_v62  ;;  %1364 = vmatmul.bf16.gmra.mxu2 %v2153_v0 }
 0x15d   : > { %1453 = vmatmul.bf16.gmra.mxu3 %v2157_v37 }
 0x15e   : > { %2321 = vmatmul.msk.bf16.gmra.mxu0 %vm1054_vm0, %v2161_v2  ;;  %v1565_v13 = vmul.f32 %v2953_v63, %v1501_v5 }
 0x15f   : > { %v1325_v57 = vpop.f32.mrf.mxu2 }
 0x160   : > { %v1601_v8 = vadd.f32 %v2968_v42, %v1565_v13  ;;  %v1326_v9 = vadd.f32 %v1325_v57, %v1237_v17  ;;  %v1414_v11 = vpop.f32.mrf.mxu3 }
 0x161   : > { %v1238_v12 = vpop.f32.mrf.mxu1 }
 0x162   : > { %v1633_v40 = vmax.f32 %v1601_v8, 0.0  ;;  %v1415_v25 = vadd.f32 %v1414_v11, %v1326_v9  ;;  %v1239_v29 = vadd.f32 %v1238_v12, %v2932_v22 }
 0x163   : > { %v1505_v26 = vpop.f32.mrf.mxu0 }
 0x164   : > { %v2473_v27 = vpack.c.bf16 %v1633_v40, %v1632_v24  ;;  %v1504_v28 = vadd.f32 %v1503_v4, %v1415_v25 }
 0x166   : > { %2525 = vst [vmem:[%s2979_s14 + $0x30] sm:$0xff] %v2473_v27   ;;  %v1566_v10 = vmul.f32 %v2953_v63, %v1504_v28 }
 0x167   : > { %v1327_v32 = vpop.f32.mrf.mxu2 }
 0x168   : > { %v1328_v20 = vadd.f32 %v1327_v32, %v1239_v29  ;;  %v1416_v33 = vpop.f32.mrf.mxu3  ;;  %v1602_v47 = vadd.f32 %v2968_v42, %v1566_v10 }
 0x169   : > { %v1241_v21 = vpop.f32.mrf.mxu1 }
 0x16a   : > { %v1417_v44 = vadd.f32 %v1416_v33, %v1328_v20  ;;  %v1242_v61 = vadd.f32 %v1241_v21, %v2853_v18  ;;  %v1634_v49 = vmax.f32 %v1602_v47, 0.0 }
 0x16b   : > { %v1508_v45 = vpop.f32.mrf.mxu0 }
 0x16c   : > { %v1506_v23 = vadd.f32 %v1505_v26, %v1417_v44 }
 0x16e   : > { %v1567_v41 = vmul.f32 %v2953_v63, %v1506_v23 }
 0x16f   : > { %v1330_v46 = vpop.f32.mrf.mxu2 }
 0x170   : > { %v1603_v54 = vadd.f32 %v2968_v42, %v1567_v41  ;;  %v1331_v22 = vadd.f32 %v1330_v46, %v1242_v61  ;;  %v1419_v43 = vpop.f32.mrf.mxu3 }
 0x171   : > { %v1243_v48 = vpop.f32.mrf.mxu1 }
 0x172   : > { %v1635_v52 = vmax.f32 %v1603_v54, 0.0  ;;  %v1420_v53 = vadd.f32 %v1419_v43, %v1331_v22  ;;  %v1244_v62 = vadd.f32 %v1243_v48, %v2869_v30 }
 0x173   : > { %v1510_v55 = vpop.f32.mrf.mxu0 }
 0x174   : > { %v2478_v56 = vpack.c.bf16 %v1635_v52, %v1634_v49  ;;  %v1509_v34 = vadd.f32 %v1508_v45, %v1420_v53 }
 0x176   : > { %2526 = vst [vmem:[%s2979_s14 + $0x38] sm:$0xff] %v2478_v56   ;;  %v1568_v18 = vmul.f32 %v2953_v63, %v1509_v34 }
 0x177   : > { %v1332_v0 = vpop.f32.mrf.mxu2 }
 0x178   : > { %v1333_v1 = vadd.f32 %v1332_v0, %v1244_v62  ;;  %v1421_v37 = vpop.f32.mrf.mxu3  ;;  %v1604_v5 = vadd.f32 %v2968_v42, %v1568_v18 }
 0x179   : > { %v1246_v2 = vpop.f32.mrf.mxu1 }
 0x17a   : > { %v1422_v14 = vadd.f32 %v1421_v37, %v1333_v1  ;;  %v1247_v13 = vadd.f32 %v1246_v2, %v2878_v38  ;;  %v1636_v11 = vmax.f32 %v1604_v5, 0.0 }
 0x17b   : > { %v1513_v3 = vpop.f32.mrf.mxu0 }
 0x17c   : > { %v1511_v4 = vadd.f32 %v1510_v55, %v1422_v14 }
 0x17e   : > { %v1569_v60 = vmul.f32 %v2953_v63, %v1511_v4 }
 0x17f   : > { %v1335_v17 = vpop.f32.mrf.mxu2 }
 0x180   : > { %v1605_v57 = vadd.f32 %v2968_v42, %v1569_v60  ;;  %v1336_v30 = vadd.f32 %v1335_v17, %v1247_v13  ;;  %v1424_v8 = vpop.f32.mrf.mxu3 }
 0x181   : > { %v1248_v9 = vpop.f32.mrf.mxu1 }
 0x182   : > { %v1637_v12 = vmax.f32 %v1605_v57, 0.0  ;;  %v1425_v24 = vadd.f32 %v1424_v8, %v1336_v30  ;;  %v1249_v27 = vadd.f32 %v1248_v9, %v2894_v50 }
 0x183   : > { %v1515_v40 = vpop.f32.mrf.mxu0 }
 0x184   : > { %v2483_v25 = vpack.c.bf16 %v1637_v12, %v1636_v11  ;;  %v1514_v26 = vadd.f32 %v1513_v3, %v1425_v24 }
 0x186   : > { %2527 = vst [vmem:[%s2979_s14 + $0x40] sm:$0xff] %v2483_v25   ;;  %v1570_v38 = vmul.f32 %v2953_v63, %v1514_v26 }
 0x187   : > { %v1337_v28 = vpop.f32.mrf.mxu2 }
 0x188   : > { %v1338_v29 = vadd.f32 %v1337_v28, %v1249_v27  ;;  %v1426_v32 = vpop.f32.mrf.mxu3  ;;  %v1606_v44 = vadd.f32 %v2968_v42, %v1570_v38 }
 0x189   : > { %v1251_v20 = vpop.f32.mrf.mxu1 }
 0x18a   : > { %v1427_v33 = vadd.f32 %v1426_v32, %v1338_v29  ;;  %v1252_v23 = vadd.f32 %v1251_v20, %v2903_v58  ;;  %v1638_v54 = vmax.f32 %v1606_v44, 0.0 }
 0x18b   : > { %v1518_v21 = vpop.f32.mrf.mxu0 }
 0x18c   : > { %v1516_v10 = vadd.f32 %v1515_v40, %v1427_v33 }
 0x18e   : > { %v1571_v45 = vmul.f32 %v2953_v63, %v1516_v10 }
 0x18f   : > { %v1340_v47 = vpop.f32.mrf.mxu2 }
 0x190   : > { %v1607_v41 = vadd.f32 %v2968_v42, %v1571_v45  ;;  %v1341_v50 = vadd.f32 %v1340_v47, %v1252_v23  ;;  %v1429_v61 = vpop.f32.mrf.mxu3 }
 0x191   : > { %v1253_v46 = vpop.f32.mrf.mxu1 }
 0x192   : > { %v1639_v22 = vmax.f32 %v1607_v41, 0.0  ;;  %v1430_v43 = vadd.f32 %v1429_v61, %v1341_v50  ;;  %v1254_v53 = vadd.f32 %v1253_v46, %v2919_v6 }
 0x193   : > { %v1520_v48 = vpop.f32.mrf.mxu0 }
 0x194   : > { %v2488_v49 = vpack.c.bf16 %v1639_v22, %v1638_v54  ;;  %v1519_v52 = vadd.f32 %v1518_v21, %v1430_v43 }
 0x196   : > { %2528 = vst [vmem:[%s2979_s14 + $0x48] sm:$0xff] %v2488_v49   ;;  %v1572_v58 = vmul.f32 %v2953_v63, %v1519_v52 }
 0x197   : > { %v1342_v55 = vpop.f32.mrf.mxu2 }
 0x198   : > { %v1343_v56 = vadd.f32 %v1342_v55, %v1254_v53  ;;  %v1431_v34 = vpop.f32.mrf.mxu3  ;;  %v1608_v2 = vadd.f32 %v2968_v42, %v1572_v58 }
 0x199   : > { %v1256_v62 = vpop.f32.mrf.mxu1 }
 0x19a   : > { %v1432_v0 = vadd.f32 %v1431_v34, %v1343_v56  ;;  %v1257_v14 = vadd.f32 %v1256_v62, %v2928_v15  ;;  %v1640_v13 = vmax.f32 %v1608_v2, 0.0 }
 0x19b   : > { %v1523_v1 = vpop.f32.mrf.mxu0 }
 0x19c   : > { %v1521_v37 = vadd.f32 %v1520_v48, %v1432_v0 }
 0x19e   : > { %v1573_v18 = vmul.f32 %v2953_v63, %v1521_v37 }
 0x19f   : > { %v1345_v3 = vpop.f32.mrf.mxu2 }
 0x1a0   : > { %v1609_v4 = vadd.f32 %v2968_v42, %v1573_v18  ;;  %v1346_v6 = vadd.f32 %v1345_v3, %v1257_v14  ;;  %v1434_v5 = vpop.f32.mrf.mxu3 }
 0x1a1   : > { %v1258_v60 = vpop.f32.mrf.mxu1 }
 0x1a2   : > { %v1641_v17 = vmax.f32 %v1609_v4, 0.0  ;;  %v1435_v57 = vadd.f32 %v1434_v5, %v1346_v6  ;;  %v1259_v11 = vadd.f32 %v1258_v60, %v2944_v35 }
 0x1a3   : > { %v1525_v30 = vpop.f32.mrf.mxu0 }
 0x1a4   : > { %v2493_v8 = vpack.c.bf16 %v1641_v17, %v1640_v13  ;;  %v1524_v9 = vadd.f32 %v1523_v1, %v1435_v57 }
 0x1a6   : > { %2529 = vst [vmem:[%s2979_s14 + $0x50] sm:$0xff] %v2493_v8   ;;  %v1574_v15 = vmul.f32 %v2953_v63, %v1524_v9 }
 0x1a7   : > { %v1347_v12 = vpop.f32.mrf.mxu2 }
 0x1a8   : > { %v1348_v24 = vadd.f32 %v1347_v12, %v1259_v11  ;;  %v1436_v40 = vpop.f32.mrf.mxu3  ;;  %v1610_v29 = vadd.f32 %v2968_v42, %v1574_v15 }
 0x1a9   : > { %v1261_v25 = vpop.f32.mrf.mxu1 }
 0x1aa   : > { %v1437_v26 = vadd.f32 %v1436_v40, %v1348_v24  ;;  %v1262_v20 = vadd.f32 %v1261_v25, %v2855_v19  ;;  %v1642_v44 = vmax.f32 %v1610_v29, 0.0 }
 0x1ab   : > { %v1528_v27 = vpop.f32.mrf.mxu0 }
 0x1ac   : > { %v1526_v28 = vadd.f32 %v1525_v30, %v1437_v26 }
 0x1ae   : > { %v1575_v32 = vmul.f32 %v2953_v63, %v1526_v28 }
 0x1af   : > { %v1350_v38 = vpop.f32.mrf.mxu2 }
 0x1b0   : > { %v1611_v33 = vadd.f32 %v2968_v42, %v1575_v32  ;;  %v1351_v35 = vadd.f32 %v1350_v38, %v1262_v20  ;;  %v1439_v21 = vpop.f32.mrf.mxu3 }
 0x1b1   : > { %v1263_v10 = vpop.f32.mrf.mxu1 }
 0x1b2   : > { %v1643_v45 = vmax.f32 %v1611_v33, 0.0  ;;  %v1440_v23 = vadd.f32 %v1439_v21, %v1351_v35  ;;  %v1264_v61 = vadd.f32 %v1263_v10, %v2871_v31 }
 0x1b3   : > { %v1530_v47 = vpop.f32.mrf.mxu0 }
 0x1b4   : > { %v2498_v41 = vpack.c.bf16 %v1643_v45, %v1642_v44  ;;  %v1529_v50 = vadd.f32 %v1528_v27, %v1440_v23 }
 0x1b6   : > { %2530 = vst [vmem:[%s2979_s14 + $0x58] sm:$0xff] %v2498_v41   ;;  %v1576_v19 = vmul.f32 %v2953_v63, %v1529_v50 }
 0x1b7   : > { %v1352_v46 = vpop.f32.mrf.mxu2 }
 0x1b8   : > { %v1353_v54 = vadd.f32 %v1352_v46, %v1264_v61  ;;  %v1441_v22 = vpop.f32.mrf.mxu3  ;;  %v1612_v53 = vadd.f32 %v2968_v42, %v1576_v19 }
 0x1b9   : > { %v1266_v43 = vpop.f32.mrf.mxu1 }
 0x1ba   : > { %v1442_v48 = vadd.f32 %v1441_v22, %v1353_v54  ;;  %v1267_v56 = vadd.f32 %v1266_v43, %v2880_v39  ;;  %v1644_v1 = vmax.f32 %v1612_v53, 0.0 }
 0x1bb   : > { %v1533_v49 = vpop.f32.mrf.mxu0 }
 0x1bc   : > { %v1531_v52 = vadd.f32 %v1530_v47, %v1442_v48 }
 0x1be   : > { %v1577_v55 = vmul.f32 %v2953_v63, %v1531_v52 }
 0x1bf   : > { %v1355_v34 = vpop.f32.mrf.mxu2 }
 0x1c0   : > { %v1613_v62 = vadd.f32 %v2968_v42, %v1577_v55  ;;  %v1356_v31 = vadd.f32 %v1355_v34, %v1267_v56  ;;  %v1444_v58 = vpop.f32.mrf.mxu3 }
 0x1c1   : > { %v1268_v0 = vpop.f32.mrf.mxu1 }
 0x1c2   : > { %v1645_v37 = vmax.f32 %v1613_v62, 0.0  ;;  %v1445_v2 = vadd.f32 %v1444_v58, %v1356_v31  ;;  %v1269_v4 = vadd.f32 %v1268_v0, %v2896_v51 }
 0x1c3   : > { %v1535_v18 = vpop.f32.mrf.mxu0 }
 0x1c4   : > { %v2503_v14 = vpack.c.bf16 %v1645_v37, %v1644_v1  ;;  %v1534_v3 = vadd.f32 %v1533_v49, %v1445_v2 }
 0x1c6   : > { %2531 = vst [vmem:[%s2979_s14 + $0x60] sm:$0xff] %v2503_v14   ;;  %v1578_v39 = vmul.f32 %v2953_v63, %v1534_v3 }
 0x1c7   : > { %v1357_v6 = vpop.f32.mrf.mxu2 }
 0x1c8   : > { %v1358_v5 = vadd.f32 %v1357_v6, %v1269_v4  ;;  %v1446_v60 = vpop.f32.mrf.mxu3  ;;  %v1614_v8 = vadd.f32 %v2968_v42, %v1578_v39 }
 0x1c9   : > { %v1271_v13 = vpop.f32.mrf.mxu1 }
 0x1ca   : > { %v1447_v17 = vadd.f32 %v1446_v60, %v1358_v5  ;;  %v1272_v11 = vadd.f32 %v1271_v13, %v2905_v59  ;;  %v1646_v15 = vmax.f32 %v1614_v8, 0.0 }
 0x1cb   : > { %v1538_v30 = vpop.f32.mrf.mxu0 }
 0x1cc   : > { %v1536_v57 = vadd.f32 %v1535_v18, %v1447_v17 }
 0x1ce   : > { %v1579_v9 = vmul.f32 %v2953_v63, %v1536_v57 }
 0x1cf   : > { %v1360_v12 = vpop.f32.mrf.mxu2 }
 0x1d0   : > { %v1615_v24 = vadd.f32 %v2968_v42, %v1579_v9  ;;  %v1361_v51 = vadd.f32 %v1360_v12, %v1272_v11  ;;  %v1449_v40 = vpop.f32.mrf.mxu3 }
 0x1d1   : > { %v1273_v25 = vpop.f32.mrf.mxu1 }
 0x1d2   : > { %v1647_v26 = vmax.f32 %v1615_v24, 0.0  ;;  %v1450_v27 = vadd.f32 %v1449_v40, %v1361_v51  ;;  %v1274_v32 = vadd.f32 %v1273_v25, %v2921_v7 }
 0x1d3   : > { %v1540_v20 = vpop.f32.mrf.mxu0 }
 0x1d4   : > { %v2508_v28 = vpack.c.bf16 %v1647_v26, %v1646_v15  ;;  %v1539_v29 = vadd.f32 %v1538_v30, %v1450_v27 }
 0x1d6   : > { %2532 = vst [vmem:[%s2979_s14 + $0x68] sm:$0xff] %v2508_v28   ;;  %v1580_v59 = vmul.f32 %v2953_v63, %v1539_v29 }
 0x1d7   : > { %v1362_v38 = vpop.f32.mrf.mxu2 }
 0x1d8   : > { %v1363_v33 = vadd.f32 %v1362_v38, %v1274_v32  ;;  %v1451_v35 = vpop.f32.mrf.mxu3  ;;  %v1616_v45 = vadd.f32 %v2968_v42, %v1580_v59 }
 0x1d9   : > { %v1276_v21 = vpop.f32.mrf.mxu1 }
 0x1da   : > { %v1452_v10 = vadd.f32 %v1451_v35, %v1363_v33  ;;  %v1277_v47 = vadd.f32 %v1276_v21, %v2930_v16  ;;  %v1648_v54 = vmax.f32 %v1616_v45, 0.0 }
 0x1db   : > { %v1543_v46 = vpop.f32.mrf.mxu0 }
 0x1dc   : > { %v1541_v44 = vadd.f32 %v1540_v20, %v1452_v10 }
 0x1de   : > { %v1581_v23 = vmul.f32 %v2953_v63, %v1541_v44 }
 0x1df   : > { %v1365_v41 = vpop.f32.mrf.mxu2 }
 0x1e0   : > { %v1617_v50 = vadd.f32 %v2968_v42, %v1581_v23  ;;  %v1366_v7 = vadd.f32 %v1365_v41, %v1277_v47  ;;  %v1454_v61 = vpop.f32.mrf.mxu3 }
 0x1e1   : > { %v1278_v19 = vpop.f32.mrf.mxu1 }
 0x1e2   : > { %v1649_v22 = vmax.f32 %v1617_v50, 0.0  ;;  %v1455_v43 = vadd.f32 %v1454_v61, %v1366_v7  ;;  %v1279_v52 = vadd.f32 %v1278_v19, %v2946_v36 }
 0x1e3   : > { %v1545_v62 = vpop.f32.mrf.mxu0 }
 0x1e4   : > { %v2513_v48 = vpack.c.bf16 %v1649_v22, %v1648_v54  ;;  %v1544_v49 = vadd.f32 %v1543_v46, %v1455_v43 }
 0x1e6   : > { %2533 = vst [vmem:[%s2979_s14 + $0x70] sm:$0xff] %v2513_v48   ;;  %v1582_v16 = vmul.f32 %v2953_v63, %v1544_v49 }
 0x1e7   : > { %v1367_v53 = vpop.f32.mrf.mxu2 }
 0x1e8   : > { %v1368_v55 = vadd.f32 %v1367_v53, %v1279_v52  ;;  %v1456_v56 = vpop.f32.mrf.mxu3  ;;  %v1618_v58 = vadd.f32 %v2968_v42, %v1582_v16 }
 0x1ea   : > { %v1457_v34 = vadd.f32 %v1456_v56, %v1368_v55  ;;  %v1650_v37 = vmax.f32 %v1618_v58, 0.0 }
 0x1ec   : > { %v1546_v31 = vadd.f32 %v1545_v62, %v1457_v34 }
 0x1ee   : > { %v1583_v0 = vmul.f32 %v2953_v63, %v1546_v31 }
 0x1f0   : > { %v1619_v1 = vadd.f32 %v2968_v42, %v1583_v0 }
 0x1f2   : > { %v1651_v2 = vmax.f32 %v1619_v1, 0.0 }
 0x1f4   : > { %v2518_v18 = vpack.c.bf16 %v1651_v2, %v1650_v37 }
 0x1f6   : > { %2534 = vst [vmem:[%s2979_s14 + $0x78] sm:$0xff] %v2518_v18  }
 0x1f7 PF: > { %s14_s17 = sadd.s32 1, %s2608_s17   ;;  %s3154_s15 = smov %s2604_s16 }
 0x1f8   : > { %p11_p5 = scmp.ge.s32.totalorder %s14_s17, 4   ;;  %s3155_s16 = smov %s3157_s18 }
 0x1fa   :  { %13 = sbr.rel (!%p11_p5) target bundleno = 2 (0x2), region = 75 }

// kernel: attention_module2_forward.29
= control target key start
LH: loop header
LB: loop body
LE: loop exit
PB: predicated region body
PF: predicated region fallthrough
CT: control target
= control target key end

     0   :  { %s1415_s15 = smov 0   ;;  %s1417_s16 = smov 0   ;;  %s1647_s0 = inlined_call_operand.vmem [shape: bf16[128,576], index: 0, kind: input, shape index: {}]   ;;  %s1648_s1 = inlined_call_operand.vmem [shape: bf16[576,128], index: 1, kind: input, shape index: {}]   ;;  %s1649_s2 = inlined_call_operand.vmem [shape: f32[1,128], index: 2, kind: input, shape index: {}]   ;;  %s1650_s3 = inlined_call_operand.vmem [shape: f32[1,128], index: 3, kind: input, shape index: {}]   ;;  %s1651_s4 = inlined_call_operand.vmem [shape: bf16[128,128], index: 4, kind: output, shape index: {}]  }
   0x1   :  { %s1419_s17 = smov 0  }
   0x2 LB: > { %s26_s18 = sadd.s32 1, %s1384_s16  ;;  %p1009_p0 = scmp.ge.s32.totalorder %s1388_s17, 1  ;;  %s1388_s17 = sphi %s1419_s17, %s14_s17   ;;  %s1384_s16 = sphi %s1417_s16, %s1653_s16   ;;  %s1380_s15 = sphi %s1415_s15, %s1652_s15  }
   0x3   : > { %p28_p1 = scmp.ge.s32.totalorder %s26_s18, 2  ;;  %p203_p2 = scmp.lt.s32.totalorder %s1388_s17, 3 }
   0x5   : > { %s1655_s18 = smov (%p28_p1, %s26_s18), 0  ;;  %p204_p3 = pnand %p1009_p0, %p203_p2 }
   0x6   : > { %s1010_s29 = sshll.u32 (!%p204_p3), %s1380_s15, 3 }
   0x7   : > { %207 = sbr.rel (%p204_p3) target bundleno = 279 (0x117), region = 36  ;;  %p244_p4 = scmp.lt.s32.totalorder (!%p204_p3), %s1010_s29, 15 }
   0xc   : > { %v1271_v0 = vld [vmem:[%s1648_s1 + $0x38] sm:$0xff]  ;;  %v1270_v1 = vld [vmem:[%s1648_s1 + $0x30] sm:$0xff]  ;;  %v1269_v4 = vld [vmem:[%s1648_s1 + $0x28] sm:$0xff]  ;;  %s1657_s29 = smov (!%p244_p4, %s1010_s29), 15  ;;  %vm682_vm0 = vcmask 523264  }
   0xd   : > { %1323 = vmatpush.bf16.msra.mxu1 %v1271_v0  ;;  %1324 = vmatpush.bf16.msra.mxu2 %v1271_v0  ;;  %v1295_v2 = vld [vmem:[%s1648_s1 + $0xf8] sm:$0xff]  ;;  %v1294_v3 = vld [vmem:[%s1648_s1 + $0xf0] sm:$0xff]  ;;  %v1293_v5 = vld [vmem:[%s1648_s1 + $0xe8] sm:$0xff]  ;;  %s1339_s19 = smul.u32 20, %s1657_s29  ;;  %s1013_s9 = sshll.u32 %s1657_s29, 2 }
   0xe   : > { %695 = vmatpush.bf16.msra.mxu0 %v1271_v0  ;;  %782 = vmatpush.bf16.msra.mxu3 %v1295_v2  ;;  %v1268_v6 = vld [vmem:[%s1648_s1 + $0x20] sm:$0xff]  ;;  %v1267_v8 = vld [vmem:[%s1648_s1 + $0x18] sm:$0xff]  ;;  %v1266_v10 = vld [vmem:[%s1648_s1 + $0x10] sm:$0xff]  ;;  %s1618_s12 = scalar_lea.vmem %s1651_s4, %s1013_s9 }
   0xf   : > { %v1292_v7 = vld [vmem:[%s1648_s1 + $0xe0] sm:$0xff]  ;;  %v1291_v9 = vld [vmem:[%s1648_s1 + $0xd8] sm:$0xff]  ;;  %v1290_v11 = vld [vmem:[%s1648_s1 + $0xd0] sm:$0xff]  ;;  %s1481_s26 = scalar_lea.vmem %s1647_s0, %s1339_s19 }
  0x10   : > { %v1265_v12 = vld [vmem:[%s1648_s1 + $0x8] sm:$0xff]  ;;  %v1264_v14 = vld [vmem:[%s1648_s1] sm:$0xff]  ;;  %v1251_v16 = vld [vmem:[%s1481_s26 + $0x38] sm:$0xf0] }
  0x11   : > { %1325 = vmatpush.bf16.msra.mxu1 %v1270_v1  ;;  %1326 = vmatpush.bf16.msra.mxu2 %v1270_v1  ;;  %v1289_v13 = vld [vmem:[%s1648_s1 + $0xc8] sm:$0xff]  ;;  %v1076_v17 = vld [vmem:[%s1481_s26 + $0x78] sm:$0xf]  ;;  %v1016_v21 = vld [vmem:[%s1481_s26] sm:$0xf] }
  0x12   : > { %696 = vmatpush.bf16.msra.mxu0 %v1270_v1  ;;  %783 = vmatpush.bf16.msra.mxu3 %v1294_v3  ;;  %v1036_v15 = vld [vmem:[%s1481_s26 + $0x28] sm:$0xf]  ;;  %v1261_v18 = vld [vmem:[%s1481_s26 + $0x88] sm:$0xf0]  ;;  %v1287_v19 = vld [vmem:[%s1648_s1 + $0xb8] sm:$0xff] }
  0x13   : > { %v1279_v20 = vld [vmem:[%s1648_s1 + $0x78] sm:$0xff]  ;;  %v1288_v22 = vld [vmem:[%s1648_s1 + $0xc0] sm:$0xff]  ;;  %v1037_v23 = vor.u32 %v1251_v16, %v1036_v15  ;;  %v1077_v24 = vor.u32 %v1261_v18, %v1076_v17  ;;  %v1246_v25 = vld [vmem:[%s1481_s26 + $0x10] sm:$0xf0] }
  0x14   : > { %v1245_v26 = vld [vmem:[%s1481_s26 + $0xc] sm:$0xf]  ;;  %v1026_v27 = vld [vmem:[%s1481_s26 + $0x1c] sm:$0xf0]  ;;  %v1299_v28 = vld [vmem:[%s1648_s1 + $0x118] sm:$0xff]  ;;  %v1017_v31 = vor.u32 %v1246_v25, %v1016_v21 }
  0x15   : > { %1327 = vmatpush.bf16.msra.mxu1 %v1269_v4  ;;  %1328 = vmatpush.bf16.msra.mxu2 %v1269_v4  ;;  %v1286_v29 = vld [vmem:[%s1648_s1 + $0xb0] sm:$0xff]  ;;  %v1029_v32 = vor.u32 %v1245_v26, %v1026_v27  ;;  %v1285_v34 = vld [vmem:[%s1648_s1 + $0xa8] sm:$0xff]  ;;  %v1284_v37 = vld [vmem:[%s1648_s1 + $0xa0] sm:$0xff] }
  0x16   : > { %697 = vmatpush.bf16.msra.mxu0 %v1269_v4  ;;  %784 = vmatpush.bf16.msra.mxu3 %v1293_v5  ;;  %v1278_v30 = vld [vmem:[%s1648_s1 + $0x70] sm:$0xff]  ;;  %v1277_v35 = vld [vmem:[%s1648_s1 + $0x68] sm:$0xff]  ;;  %v1276_v38 = vld [vmem:[%s1648_s1 + $0x60] sm:$0xff] }
  0x17   : > { %v1298_v33 = vld [vmem:[%s1648_s1 + $0x110] sm:$0xff]  ;;  %v1297_v36 = vld [vmem:[%s1648_s1 + $0x108] sm:$0xff]  ;;  %v1256_v40 = vld [vmem:[%s1481_s26 + $0x60] sm:$0xf0] }
  0x18   : > { %v1056_v39 = vld [vmem:[%s1481_s26 + $0x50] sm:$0xf]  ;;  %v1296_v41 = vld [vmem:[%s1648_s1 + $0x100] sm:$0xff]  ;;  %v1283_v42 = vld [vmem:[%s1648_s1 + $0x98] sm:$0xff] }
  0x19   : > { %1329 = vmatpush.bf16.msra.mxu1 %v1268_v6  ;;  %1330 = vmatpush.bf16.msra.mxu2 %v1268_v6  ;;  %v1275_v43 = vld [vmem:[%s1648_s1 + $0x58] sm:$0xff]  ;;  %v1032_v44 = vld [vmem:[%s1481_s26 + $0x10] sm:$0xf]  ;;  %v1057_v45 = vor.u32 %v1256_v40, %v1056_v39  ;;  %v1248_v46 = vld [vmem:[%s1481_s26 + $0x20] sm:$0xf0] }
  0x1a   : > { %698 = vmatpush.bf16.msra.mxu0 %v1268_v6  ;;  %785 = vmatpush.bf16.msra.mxu3 %v1292_v7  ;;  %v1250_v47 = vld [vmem:[%s1481_s26 + $0x34] sm:$0xf]  ;;  %v1046_v48 = vld [vmem:[%s1481_s26 + $0x44] sm:$0xf0]  ;;  %v1033_v51 = vor.u32 %v1248_v46, %v1032_v44  ;;  %v1280_v55 = vld [vmem:[%s1648_s1 + $0x80] sm:$0xff] }
  0x1b   : > { %v1282_v49 = vld [vmem:[%s1648_s1 + $0x90] sm:$0xff]  ;;  %v1049_v52 = vor.u32 %v1250_v47, %v1046_v48  ;;  %v1281_v53 = vld [vmem:[%s1648_s1 + $0x88] sm:$0xff]  ;;  %v1272_v56 = vld [vmem:[%s1648_s1 + $0x40] sm:$0xff] }
  0x1c   : > { %v1274_v50 = vld [vmem:[%s1648_s1 + $0x50] sm:$0xff]  ;;  %v1273_v54 = vld [vmem:[%s1648_s1 + $0x48] sm:$0xff]  ;;  %v1247_v58 = vld [vmem:[%s1481_s26 + $0x18] sm:$0xf0] }
  0x1d   : > { %1331 = vmatpush.bf16.msra.mxu1 %v1267_v8  ;;  %1332 = vmatpush.bf16.msra.mxu2 %v1267_v8  ;;  %v1024_v57 = vld [vmem:[%s1481_s26 + $0x8] sm:$0xf]  ;;  %v1244_v60 = vld [vmem:[%s1481_s26 + $0x4] sm:$0xf]  ;;  %v1018_v61 = vld [vmem:[%s1481_s26 + $0x14] sm:$0xf0] }
  0x1e   : > { %699 = vmatpush.bf16.msra.mxu0 %v1267_v8  ;;  %786 = vmatpush.bf16.msra.mxu3 %v1291_v9  ;;  %v1025_v59 = vor.u32 %v1247_v58, %v1024_v57  ;;  %v1052_v62 = vld [vmem:[%s1481_s26 + $0x38] sm:$0xf]  ;;  %v1021_v63 = vor.u32 %v1244_v60, %v1018_v61  ;;  %v1253_v0 = vld [vmem:[%s1481_s26 + $0x48] sm:$0xf0]  ;;  %v1255_v1 = vld [vmem:[%s1481_s26 + $0x5c] sm:$0xf] }
  0x1f   : > { %v1066_v2 = vld [vmem:[%s1481_s26 + $0x6c] sm:$0xf0]  ;;  %v1053_v3 = vor.u32 %v1253_v0, %v1052_v62  ;;  %v1252_v6 = vld [vmem:[%s1481_s26 + $0x40] sm:$0xf0]  ;;  %v1249_v8 = vld [vmem:[%s1481_s26 + $0x2c] sm:$0xf] }
  0x20   : > { %v1069_v4 = vor.u32 %v1255_v1, %v1066_v2  ;;  %v1044_v5 = vld [vmem:[%s1481_s26 + $0x30] sm:$0xf]  ;;  %v1038_v9 = vld [vmem:[%s1481_s26 + $0x3c] sm:$0xf0]  ;;  %v1064_v17 = vld [vmem:[%s1481_s26 + $0x58] sm:$0xf] }
  0x21   : > { %1333 = vmatpush.bf16.msra.mxu1 %v1266_v10  ;;  %1334 = vmatpush.bf16.msra.mxu2 %v1266_v10  ;;  %v1045_v7 = vor.u32 %v1252_v6, %v1044_v5  ;;  %v1257_v18 = vld [vmem:[%s1481_s26 + $0x68] sm:$0xf0]  ;;  %v1058_v21 = vld [vmem:[%s1481_s26 + $0x64] sm:$0xf0]  ;;  %v1084_v26 = vld [vmem:[%s1481_s26 + $0x80] sm:$0xf] }
  0x22   : > { %700 = vmatpush.bf16.msra.mxu0 %v1266_v10  ;;  %787 = vmatpush.bf16.msra.mxu3 %v1290_v11  ;;  %v1072_v10 = vld [vmem:[%s1481_s26 + $0x60] sm:$0xf]  ;;  %v1041_v11 = vor.u32 %v1249_v8, %v1038_v9  ;;  %v1262_v27 = vld [vmem:[%s1481_s26 + $0x90] sm:$0xf0] }
  0x23   : > { %v1609_v58 = vld [vmem:[%s1650_s3] ss:$0 sm:$0xff] }
  0x25   : > { %1335 = vmatpush.bf16.msra.mxu1 %v1265_v12  ;;  %1336 = vmatpush.bf16.msra.mxu2 %v1265_v12 }
  0x26   : > { %701 = vmatpush.bf16.msra.mxu0 %v1265_v12  ;;  %788 = vmatpush.bf16.msra.mxu3 %v1289_v13  ;;  %v1258_v12 = vld [vmem:[%s1481_s26 + $0x70] sm:$0xf0]  ;;  %v1260_v13 = vld [vmem:[%s1481_s26 + $0x84] sm:$0xf] }
  0x27   : > { %v1073_v15 = vor.u32 %v1258_v12, %v1072_v10 }
  0x29   : > { %1337 = vmatpush.bf16.msra.mxu1 %v1264_v14  ;;  %1338 = vmatpush.bf16.msra.mxu2 %v1264_v14 }
  0x2a   : > { %702 = vmatpush.bf16.msra.mxu0 %v1264_v14  ;;  %789 = vmatpush.bf16.msra.mxu3 %v1288_v22  ;;  %v1086_v14 = vld [vmem:[%s1481_s26 + $0x94] sm:$0xf0] }
  0x2b   : > { %v1089_v16 = vor.u32 %v1260_v13, %v1086_v14 }
  0x2c   : > { %708 = vmatmul.bf16.vlgmr.msra.gmra.mxu1 %v1037_v23  ;;  %718 = vmatmul.bf16.vlgmr.msra.gmra.mxu2 %v1077_v24  ;;  %v1092_v23 = vld [vmem:[%s1481_s26 + $0x88] sm:$0xf]  ;;  %v1263_v24 = vld [vmem:[%s1481_s26 + $0x98] sm:$0xf0] }
  0x2d   : > { %753 = vmatpush.bf16.msrb.mxu2 %v1287_v19  ;;  %724 = vmatpush.bf16.msrb.mxu1 %v1279_v20  ;;  %v1065_v19 = vor.u32 %v1257_v18, %v1064_v17  ;;  %v1254_v20 = vld [vmem:[%s1481_s26 + $0x54] sm:$0xf]  ;;  %v1093_v25 = vor.u32 %v1263_v24, %v1092_v23 }
  0x2e   : > { %815 = vmatpush.bf16.msrb.mxu0 %v1299_v28  ;;  %790 = vmatmul.bf16.vlgmr.msra.gmra.mxu3 %v1029_v32  ;;  %v1061_v22 = vor.u32 %v1254_v20, %v1058_v21  ;;  %v1085_v28 = vor.u32 %v1262_v27, %v1084_v26 }
  0x2f   : > { %703 = vmatmul.bf16.vlgmr.msra.gmra.mxu0 %v1017_v31 }
  0x31   : > { %754 = vmatpush.bf16.msrb.mxu2 %v1286_v29  ;;  %725 = vmatpush.bf16.msrb.mxu1 %v1278_v30  ;;  %v1259_v29 = vld [vmem:[%s1481_s26 + $0x7c] sm:$0xf]  ;;  %v1078_v30 = vld [vmem:[%s1481_s26 + $0x8c] sm:$0xf0] }
  0x32   : > { %816 = vmatpush.bf16.msrb.mxu0 %v1298_v33  ;;  %v1081_v31 = vor.u32 %v1259_v29, %v1078_v30 }
  0x35   : > { %755 = vmatpush.bf16.msrb.mxu2 %v1285_v34  ;;  %726 = vmatpush.bf16.msrb.mxu1 %v1277_v35 }
  0x36   : > { %817 = vmatpush.bf16.msrb.mxu0 %v1297_v36 }
  0x39   : > { %756 = vmatpush.bf16.msrb.mxu2 %v1284_v37  ;;  %727 = vmatpush.bf16.msrb.mxu1 %v1276_v38 }
  0x3a   : > { %818 = vmatpush.bf16.msrb.mxu0 %v1296_v41 }
  0x3c   : > { %713 = vmatmul.bf16.gmra.mxu1 %v1057_v45 }
  0x3d   : > { %757 = vmatpush.bf16.msrb.mxu2 %v1283_v42  ;;  %728 = vmatpush.bf16.msrb.mxu1 %v1275_v43 }
  0x3e   : > { %795 = vmatmul.bf16.gmra.mxu3 %v1049_v52  ;;  %v1603_v52 = vld [vmem:[%s1649_s2] ss:$0 sm:$0xff] }
  0x3f   : > { %1238 = vmatmul.msk.bf16.vlgmr.msrb.gmra.mxu0 %vm682_vm0, %v1033_v51 }
  0x41   : > { %758 = vmatpush.bf16.msrb.mxu2 %v1282_v49  ;;  %729 = vmatpush.bf16.msrb.mxu1 %v1274_v50 }
  0x45   : > { %759 = vmatpush.bf16.msrb.mxu2 %v1281_v53  ;;  %730 = vmatpush.bf16.msrb.mxu1 %v1273_v54 }
  0x49   : > { %760 = vmatpush.bf16.msrb.mxu2 %v1280_v55  ;;  %731 = vmatpush.bf16.msrb.mxu1 %v1272_v56 }
  0x4c   : > { %761 = vmatmul.bf16.vlgmr.msrb.gmra.mxu2 %v1025_v59  ;;  %732 = vmatmul.bf16.vlgmr.msrb.gmra.mxu1 %v1021_v63 }
  0x4e   : > { %800 = vmatmul.bf16.gmra.mxu3 %v1069_v4 }
  0x4f   : > { %1239 = vmatmul.msk.bf16.gmra.mxu0 %vm682_vm0, %v1053_v3 }
  0x5c   : > { %766 = vmatmul.bf16.gmra.mxu2 %v1045_v7  ;;  %737 = vmatmul.bf16.gmra.mxu1 %v1041_v11 }
  0x5e   : > { %805 = vmatmul.bf16.gmra.mxu3 %v1089_v16 }
  0x5f   : > { %1240 = vmatmul.msk.bf16.gmra.mxu0 %vm682_vm0, %v1073_v15 }
  0x6c   : > { %771 = vmatmul.bf16.gmra.mxu2 %v1065_v19  ;;  %742 = vmatmul.bf16.gmra.mxu1 %v1061_v22 }
  0x6f   : > { %1241 = vmatmul.msk.bf16.gmra.mxu0 %vm682_vm0, %v1093_v25 }
  0x7c   : > { %776 = vmatmul.bf16.gmra.mxu2 %v1085_v28  ;;  %747 = vmatmul.bf16.gmra.mxu1 %v1081_v31 }
  0xa9   : > { %v709_v32 = vpop.f32.mrf.mxu1 }
  0xac   : > { %v704_v33 = vpop.f32.mrf.mxu0 }
  0xaf   : > { %v1596_v37 = vpop.f32.mrf.mxu2 }
  0xb1   : > { %v711_v34 = vpop.f32.mrf.mxu1  ;;  %v791_v38 = vpop.f32.mrf.mxu3 }
  0xb4   : > { %v706_v35 = vpop.f32.mrf.mxu0 }
  0xb7   : > { %v1598_v41 = vpop.f32.mrf.mxu2 }
  0xb9   : > { %v714_v36 = vpop.f32.mrf.mxu1  ;;  %v793_v44 = vpop.f32.mrf.mxu3 }
  0xbc   : > { %v820_v40 = vpop.f32.mrf.mxu0 }
  0xc1   : > { %v716_v39 = vpop.f32.mrf.mxu1  ;;  %v796_v54 = vpop.f32.mrf.mxu3 }
  0xc4   : > { %v822_v46 = vpop.f32.mrf.mxu0 }
  0xc9   : > { %v733_v42 = vpop.f32.mrf.mxu1  ;;  %v798_v4 = vpop.f32.mrf.mxu3 }
  0xca   : > { %v734_v43 = vadd.f32 %v733_v42, %v704_v33 }
  0xcc   : > { %v825_v56 = vpop.f32.mrf.mxu0 }
  0xcf   : > { %v762_v45 = vpop.f32.mrf.mxu2 }
  0xd0   : > { %v763_v47 = vadd.f32 %v762_v45, %v734_v43 }
  0xd1   : > { %v735_v49 = vpop.f32.mrf.mxu1  ;;  %v801_v17 = vpop.f32.mrf.mxu3 }
  0xd2   : > { %v792_v48 = vadd.f32 %v791_v38, %v763_v47  ;;  %v736_v50 = vadd.f32 %v735_v49, %v706_v35 }
  0xd4   : > { %v821_v51 = vadd.f32 %v820_v40, %v792_v48  ;;  %v827_v8 = vpop.f32.mrf.mxu0 }
  0xd6   : > { %v844_v57 = vmul.f32 %v1603_v52, %v821_v51 }
  0xd7   : > { %v764_v53 = vpop.f32.mrf.mxu2 }
  0xd8   : > { %v765_v55 = vadd.f32 %v764_v53, %v736_v50  ;;  %v856_v63 = vadd.f32 %v1609_v58, %v844_v57 }
  0xd9   : > { %v738_v61 = vpop.f32.mrf.mxu1 }
  0xda   : > { %v794_v59 = vadd.f32 %v793_v44, %v765_v55  ;;  %v739_v62 = vadd.f32 %v738_v61, %v709_v32  ;;  %v864_v5 = vmax.f32 %v856_v63, 0.0  ;;  %v803_v32 = vpop.f32.mrf.mxu3 }
  0xdc   : > { %v823_v60 = vadd.f32 %v822_v46, %v794_v59  ;;  %v830_v20 = vpop.f32.mrf.mxu0 }
  0xde   : > { %v845_v0 = vmul.f32 %v1603_v52, %v823_v60 }
  0xdf   : > { %v767_v1 = vpop.f32.mrf.mxu2 }
  0xe0   : > { %v857_v2 = vadd.f32 %v1609_v58, %v845_v0  ;;  %v768_v3 = vadd.f32 %v767_v1, %v739_v62 }
  0xe1   : > { %v740_v10 = vpop.f32.mrf.mxu1 }
  0xe2   : > { %v865_v6 = vmax.f32 %v857_v2, 0.0  ;;  %v797_v7 = vadd.f32 %v796_v54, %v768_v3  ;;  %v741_v11 = vadd.f32 %v740_v10, %v711_v34  ;;  %v806_v48 = vpop.f32.mrf.mxu3 }
  0xe4   : > { %v1303_v9 = vpack.c.bf16 %v865_v6, %v864_v5  ;;  %v826_v12 = vadd.f32 %v825_v56, %v797_v7  ;;  %v832_v35 = vpop.f32.mrf.mxu0 }
  0xe6   : > { %1304 = vst [vmem:[%s1618_s12] sm:$0xff] %v1303_v9   ;;  %v846_v15 = vmul.f32 %v1603_v52, %v826_v12 }
  0xe7   : > { %v769_v13 = vpop.f32.mrf.mxu2 }
  0xe8   : > { %v770_v14 = vadd.f32 %v769_v13, %v741_v11  ;;  %v858_v22 = vadd.f32 %v1609_v58, %v846_v15 }
  0xe9   : > { %v743_v19 = vpop.f32.mrf.mxu1 }
  0xea   : > { %v799_v16 = vadd.f32 %v798_v4, %v770_v14  ;;  %v744_v21 = vadd.f32 %v743_v19, %v714_v36  ;;  %v866_v27 = vmax.f32 %v858_v22, 0.0  ;;  %v808_v62 = vpop.f32.mrf.mxu3 }
  0xec   : > { %v828_v18 = vadd.f32 %v827_v8, %v799_v16  ;;  %v835_v51 = vpop.f32.mrf.mxu0 }
  0xee   : > { %v847_v23 = vmul.f32 %v1603_v52, %v828_v18 }
  0xef   : > { %v772_v24 = vpop.f32.mrf.mxu2 }
  0xf0   : > { %v859_v25 = vadd.f32 %v1609_v58, %v847_v23  ;;  %v773_v26 = vadd.f32 %v772_v24, %v744_v21 }
  0xf1   : > { %v745_v31 = vpop.f32.mrf.mxu1 }
  0xf2   : > { %v867_v28 = vmax.f32 %v859_v25, 0.0  ;;  %v802_v29 = vadd.f32 %v801_v17, %v773_v26  ;;  %v746_v33 = vadd.f32 %v745_v31, %v716_v39 }
  0xf4   : > { %v1308_v30 = vpack.c.bf16 %v867_v28, %v866_v27  ;;  %v831_v34 = vadd.f32 %v830_v20, %v802_v29  ;;  %v837_v1 = vpop.f32.mrf.mxu0 }
  0xf6   : > { %1320 = vst [vmem:[%s1618_s12 + $0x8] sm:$0xff] %v1308_v30   ;;  %v848_v40 = vmul.f32 %v1603_v52, %v831_v34 }
  0xf7   : > { %v774_v38 = vpop.f32.mrf.mxu2 }
  0xf8   : > { %v775_v36 = vadd.f32 %v774_v38, %v746_v33  ;;  %v860_v46 = vadd.f32 %v1609_v58, %v848_v40 }
  0xf9   : > { %v748_v44 = vpop.f32.mrf.mxu1 }
  0xfa   : > { %v804_v42 = vadd.f32 %v803_v32, %v775_v36  ;;  %v749_v45 = vadd.f32 %v748_v44, %v1596_v37  ;;  %v868_v53 = vmax.f32 %v860_v46, 0.0 }
  0xfc   : > { %v833_v43 = vadd.f32 %v832_v35, %v804_v42 }
  0xfe   : > { %v849_v47 = vmul.f32 %v1603_v52, %v833_v43 }
  0xff   : > { %v777_v49 = vpop.f32.mrf.mxu2 }
 0x100   : > { %v861_v39 = vadd.f32 %v1609_v58, %v849_v47  ;;  %v778_v50 = vadd.f32 %v777_v49, %v749_v45 }
 0x101   : > { %v750_v57 = vpop.f32.mrf.mxu1 }
 0x102   : > { %v869_v54 = vmax.f32 %v861_v39, 0.0  ;;  %v807_v55 = vadd.f32 %v806_v48, %v778_v50  ;;  %v751_v59 = vadd.f32 %v750_v57, %v1598_v41 }
 0x104   : > { %v1313_v56 = vpack.c.bf16 %v869_v54, %v868_v53  ;;  %v836_v37 = vadd.f32 %v835_v51, %v807_v55 }
 0x106   : > { %1321 = vst [vmem:[%s1618_s12 + $0x10] sm:$0xff] %v1313_v56   ;;  %v850_v63 = vmul.f32 %v1603_v52, %v836_v37 }
 0x107   : > { %v779_v60 = vpop.f32.mrf.mxu2 }
 0x108   : > { %v780_v61 = vadd.f32 %v779_v60, %v751_v59  ;;  %v862_v3 = vadd.f32 %v1609_v58, %v850_v63 }
 0x10a   : > { %v809_v0 = vadd.f32 %v808_v62, %v780_v61  ;;  %v870_v6 = vmax.f32 %v862_v3, 0.0 }
 0x10c   : > { %v838_v2 = vadd.f32 %v837_v1, %v809_v0 }
 0x10e   : > { %v851_v4 = vmul.f32 %v1603_v52, %v838_v2 }
 0x110   : > { %v863_v5 = vadd.f32 %v1609_v58, %v851_v4 }
 0x112   : > { %v871_v7 = vmax.f32 %v863_v5, 0.0 }
 0x114   : > { %v1318_v41 = vpack.c.bf16 %v871_v7, %v870_v6 }
 0x116   : > { %1322 = vst [vmem:[%s1618_s12 + $0x18] sm:$0xff] %v1318_v41  }
 0x117 PF: > { %s14_s17 = sadd.s32 1, %s1388_s17   ;;  %s1652_s15 = smov %s1384_s16 }
 0x118   : > { %p11_p5 = scmp.ge.s32.totalorder %s14_s17, 4   ;;  %s1653_s16 = smov %s1655_s18 }
 0x11a   :  { %13 = sbr.rel (!%p11_p5) target bundleno = 2 (0x2), region = 75 }

// kernel: attention_module2_forward.42
= control target key start
LH: loop header
LB: loop body
LE: loop exit
PB: predicated region body
PF: predicated region fallthrough
CT: control target
= control target key end

     0   :  { %s1143_s15 = smov 0   ;;  %s1145_s16 = smov 0   ;;  %s1321_s0 = inlined_call_operand.vmem [shape: bf16[512,64], index: 0, kind: input, shape index: {}]   ;;  %s1322_s1 = inlined_call_operand.vmem [shape: bf16[64,128], index: 1, kind: input, shape index: {}]   ;;  %s1323_s2 = inlined_call_operand.vmem [shape: f32[1,128], index: 2, kind: input, shape index: {}]   ;;  %s1324_s3 = inlined_call_operand.vmem [shape: f32[1,128], index: 3, kind: input, shape index: {}]   ;;  %s1325_s4 = inlined_call_operand.vmem [shape: bf16[512,128], index: 4, kind: output, shape index: {}]  }
   0x1   :  { %s1147_s17 = smov 0  }
   0x2 LB: > { %s26_s18 = sadd.s32 1, %s1112_s16  ;;  %p838_p0 = scmp.ge.s32.totalorder %s1116_s17, 1  ;;  %s1116_s17 = sphi %s1147_s17, %s14_s17   ;;  %s1112_s16 = sphi %s1145_s16, %s1327_s16   ;;  %s1108_s15 = sphi %s1143_s15, %s1326_s15  }
   0x3   : > { %p28_p1 = scmp.ge.s32.totalorder %s26_s18, 2  ;;  %p202_p2 = scmp.lt.s32.totalorder %s1116_s17, 3 }
   0x5   : > { %s1329_s18 = smov (%p28_p1, %s26_s18), 0  ;;  %p203_p3 = pnand %p838_p0, %p202_p2 }
   0x6   : > { %s839_s21 = sshll.u32 (!%p203_p3), %s1108_s15, 5 }
   0x7   : > { %206 = sbr.rel (%p203_p3) target bundleno = 227 (0xe3), region = 36  ;;  %p242_p4 = scmp.lt.s32.totalorder (!%p203_p3), %s839_s21, 63 }
   0xc   : > { %v960_v0 = vld [vmem:[%s1322_s1 + $0x18] sm:$0xff]  ;;  %v959_v1 = vld [vmem:[%s1322_s1 + $0x10] sm:$0xff]  ;;  %s1331_s21 = smov (!%p242_p4, %s839_s21), 63  ;;  %v958_v2 = vld [vmem:[%s1322_s1 + $0x8] sm:$0xff]  ;;  %vm411_vm0 = vcmask 523264  }
   0xd   : > { %464 = vmatpush.bf16.msra.mxu0 %v960_v0  ;;  %1056 = vmatpush.bf16.msra.mxu1 %v960_v0  ;;  %s840_s26 = sshll.u32 %s1331_s21, 2  ;;  %v957_v3 = vld [vmem:[%s1322_s1] sm:$0xff] }
   0xe   : > { %1057 = vmatpush.bf16.msra.mxu2 %v960_v0  ;;  %1058 = vmatpush.bf16.msra.mxu3 %v960_v0  ;;  %s1181_s5 = scalar_lea.vmem %s1321_s0, %s840_s26  ;;  %v1218_v22 = vld [vmem:[%s1323_s2] ss:$0 sm:$0xff]  ;;  %s1240_s12 = scalar_lea.vmem %s1325_s4, %s840_s26 }
   0xf   : > { %v941_v4 = vld [vmem:[%s1181_s5] sm:$0xff]  ;;  %v942_v8 = vld [vmem:[%s1181_s5 + $0x8] sm:$0xff]  ;;  %v943_v12 = vld [vmem:[%s1181_s5 + $0x10] sm:$0xff] }
  0x10   : > { %v945_v5 = vld [vmem:[%s1181_s5 + $0x20] sm:$0xff]  ;;  %v946_v9 = vld [vmem:[%s1181_s5 + $0x28] sm:$0xff]  ;;  %v947_v13 = vld [vmem:[%s1181_s5 + $0x30] sm:$0xff] }
  0x11   : > { %465 = vmatpush.bf16.msra.mxu0 %v959_v1  ;;  %1059 = vmatpush.bf16.msra.mxu1 %v959_v1  ;;  %v949_v6 = vld [vmem:[%s1181_s5 + $0x40] sm:$0xff]  ;;  %v950_v10 = vld [vmem:[%s1181_s5 + $0x48] sm:$0xff]  ;;  %v951_v14 = vld [vmem:[%s1181_s5 + $0x50] sm:$0xff] }
  0x12   : > { %1060 = vmatpush.bf16.msra.mxu2 %v959_v1  ;;  %1061 = vmatpush.bf16.msra.mxu3 %v959_v1  ;;  %v953_v7 = vld [vmem:[%s1181_s5 + $0x60] sm:$0xff]  ;;  %v954_v11 = vld [vmem:[%s1181_s5 + $0x68] sm:$0xff]  ;;  %v955_v15 = vld [vmem:[%s1181_s5 + $0x70] sm:$0xff] }
  0x13   : > { %v944_v16 = vld [vmem:[%s1181_s5 + $0x18] sm:$0xff]  ;;  %v1224_v24 = vld [vmem:[%s1324_s3] ss:$0 sm:$0xff] }
  0x14   : > { %v948_v17 = vld [vmem:[%s1181_s5 + $0x38] sm:$0xff] }
  0x15   : > { %466 = vmatpush.bf16.msra.mxu0 %v958_v2  ;;  %1062 = vmatpush.bf16.msra.mxu1 %v958_v2  ;;  %v952_v18 = vld [vmem:[%s1181_s5 + $0x58] sm:$0xff] }
  0x16   : > { %1063 = vmatpush.bf16.msra.mxu2 %v958_v2  ;;  %1064 = vmatpush.bf16.msra.mxu3 %v958_v2  ;;  %v956_v19 = vld [vmem:[%s1181_s5 + $0x78] sm:$0xff] }
  0x19   : > { %467 = vmatpush.bf16.msra.mxu0 %v957_v3  ;;  %1065 = vmatpush.bf16.msra.mxu1 %v957_v3 }
  0x1a   : > { %1066 = vmatpush.bf16.msra.mxu2 %v957_v3  ;;  %1067 = vmatpush.bf16.msra.mxu3 %v957_v3 }
  0x1c   : > { %923 = vmatmul.msk.bf16.vlgmr.msra.gmra.mxu0 %vm411_vm0, %v941_v4  ;;  %927 = vmatmul.msk.bf16.vlgmr.msra.gmra.mxu1 %vm411_vm0, %v945_v5 }
  0x1d   : > { %931 = vmatmul.msk.bf16.vlgmr.msra.gmra.mxu2 %vm411_vm0, %v949_v6  ;;  %935 = vmatmul.msk.bf16.vlgmr.msra.gmra.mxu3 %vm411_vm0, %v953_v7 }
  0x2c   : > { %924 = vmatmul.msk.bf16.gmra.mxu0 %vm411_vm0, %v942_v8  ;;  %928 = vmatmul.msk.bf16.gmra.mxu1 %vm411_vm0, %v946_v9 }
  0x2d   : > { %932 = vmatmul.msk.bf16.gmra.mxu2 %vm411_vm0, %v950_v10  ;;  %936 = vmatmul.msk.bf16.gmra.mxu3 %vm411_vm0, %v954_v11 }
  0x3c   : > { %925 = vmatmul.msk.bf16.gmra.mxu0 %vm411_vm0, %v943_v12  ;;  %929 = vmatmul.msk.bf16.gmra.mxu1 %vm411_vm0, %v947_v13 }
  0x3d   : > { %933 = vmatmul.msk.bf16.gmra.mxu2 %vm411_vm0, %v951_v14  ;;  %937 = vmatmul.msk.bf16.gmra.mxu3 %vm411_vm0, %v955_v15 }
  0x4c   : > { %926 = vmatmul.msk.bf16.gmra.mxu0 %vm411_vm0, %v944_v16  ;;  %930 = vmatmul.msk.bf16.gmra.mxu1 %vm411_vm0, %v948_v17 }
  0x4d   : > { %934 = vmatmul.msk.bf16.gmra.mxu2 %vm411_vm0, %v952_v18  ;;  %938 = vmatmul.msk.bf16.gmra.mxu3 %vm411_vm0, %v956_v19 }
  0x99   : > { %v469_v20 = vpop.f32.mrf.mxu0  ;;  %v489_v21 = vpop.f32.mrf.mxu1 }
  0x9a   : > { %v553_v23 = vmul.f32 %v1218_v22, %v469_v20  ;;  %v561_v25 = vmul.f32 %v1218_v22, %v489_v21 }
  0x9c   : > { %v589_v30 = vadd.f32 %v1224_v24, %v553_v23  ;;  %v597_v31 = vadd.f32 %v1224_v24, %v561_v25 }
  0x9e   : > { %v621_v38 = vmax.f32 %v589_v30, 0.0  ;;  %v629_v39 = vmax.f32 %v597_v31, 0.0 }
  0xa0   : > { %v509_v26 = vpop.f32.mrf.mxu2  ;;  %v529_v27 = vpop.f32.mrf.mxu3 }
  0xa1   : > { %v471_v28 = vpop.f32.mrf.mxu0  ;;  %v491_v29 = vpop.f32.mrf.mxu1  ;;  %v569_v36 = vmul.f32 %v1218_v22, %v509_v26  ;;  %v577_v37 = vmul.f32 %v1218_v22, %v529_v27 }
  0xa2   : > { %v554_v32 = vmul.f32 %v1218_v22, %v471_v28  ;;  %v562_v33 = vmul.f32 %v1218_v22, %v491_v29 }
  0xa3   : > { %v605_v46 = vadd.f32 %v1224_v24, %v569_v36  ;;  %v613_v47 = vadd.f32 %v1224_v24, %v577_v37 }
  0xa4   : > { %v590_v34 = vadd.f32 %v1224_v24, %v554_v32  ;;  %v598_v35 = vadd.f32 %v1224_v24, %v562_v33 }
  0xa5   : > { %v637_v54 = vmax.f32 %v605_v46, 0.0  ;;  %v645_v55 = vmax.f32 %v613_v47, 0.0 }
  0xa6   : > { %v622_v40 = vmax.f32 %v590_v34, 0.0  ;;  %v630_v41 = vmax.f32 %v598_v35, 0.0 }
  0xa8   : > { %v964_v42 = vpack.c.bf16 %v622_v40, %v621_v38  ;;  %v984_v43 = vpack.c.bf16 %v630_v41, %v629_v39  ;;  %v511_v44 = vpop.f32.mrf.mxu2  ;;  %v531_v45 = vpop.f32.mrf.mxu3 }
  0xa9   : > { %v570_v48 = vmul.f32 %v1218_v22, %v511_v44  ;;  %v578_v49 = vmul.f32 %v1218_v22, %v531_v45  ;;  %v474_v50 = vpop.f32.mrf.mxu0  ;;  %v494_v51 = vpop.f32.mrf.mxu1 }
  0xaa   : > { %965 = vst [vmem:[%s1240_s12] sm:$0xff] %v964_v42   ;;  %v555_v58 = vmul.f32 %v1218_v22, %v474_v50  ;;  %v563_v59 = vmul.f32 %v1218_v22, %v494_v51 }
  0xab   : > { %1044 = vst [vmem:[%s1240_s12 + $0x20] sm:$0xff] %v984_v43   ;;  %v606_v52 = vadd.f32 %v1224_v24, %v570_v48  ;;  %v614_v53 = vadd.f32 %v1224_v24, %v578_v49 }
  0xac   : > { %v591_v2 = vadd.f32 %v1224_v24, %v555_v58  ;;  %v599_v3 = vadd.f32 %v1224_v24, %v563_v59 }
  0xad   : > { %v638_v56 = vmax.f32 %v606_v52, 0.0  ;;  %v646_v57 = vmax.f32 %v614_v53, 0.0 }
  0xae   : > { %v623_v10 = vmax.f32 %v591_v2, 0.0  ;;  %v631_v11 = vmax.f32 %v599_v3, 0.0 }
  0xaf   : > { %v1004_v60 = vpack.c.bf16 %v638_v56, %v637_v54  ;;  %v1024_v61 = vpack.c.bf16 %v646_v57, %v645_v55 }
  0xb0   : > { %v514_v62 = vpop.f32.mrf.mxu2  ;;  %v534_v63 = vpop.f32.mrf.mxu3 }
  0xb1   : > { %1048 = vst [vmem:[%s1240_s12 + $0x40] sm:$0xff] %v1004_v60   ;;  %v476_v0 = vpop.f32.mrf.mxu0  ;;  %v496_v1 = vpop.f32.mrf.mxu1  ;;  %v571_v8 = vmul.f32 %v1218_v22, %v514_v62  ;;  %v579_v9 = vmul.f32 %v1218_v22, %v534_v63 }
  0xb2   : > { %1052 = vst [vmem:[%s1240_s12 + $0x60] sm:$0xff] %v1024_v61   ;;  %v556_v4 = vmul.f32 %v1218_v22, %v476_v0  ;;  %v564_v5 = vmul.f32 %v1218_v22, %v496_v1 }
  0xb3   : > { %v607_v18 = vadd.f32 %v1224_v24, %v571_v8  ;;  %v615_v19 = vadd.f32 %v1224_v24, %v579_v9 }
  0xb4   : > { %v592_v6 = vadd.f32 %v1224_v24, %v556_v4  ;;  %v600_v7 = vadd.f32 %v1224_v24, %v564_v5 }
  0xb5   : > { %v639_v28 = vmax.f32 %v607_v18, 0.0  ;;  %v647_v29 = vmax.f32 %v615_v19, 0.0 }
  0xb6   : > { %v624_v12 = vmax.f32 %v592_v6, 0.0  ;;  %v632_v13 = vmax.f32 %v600_v7, 0.0 }
  0xb8   : > { %v969_v14 = vpack.c.bf16 %v624_v12, %v623_v10  ;;  %v989_v15 = vpack.c.bf16 %v632_v13, %v631_v11  ;;  %v516_v16 = vpop.f32.mrf.mxu2  ;;  %v536_v17 = vpop.f32.mrf.mxu3 }
  0xb9   : > { %v572_v20 = vmul.f32 %v1218_v22, %v516_v16  ;;  %v580_v21 = vmul.f32 %v1218_v22, %v536_v17  ;;  %v479_v23 = vpop.f32.mrf.mxu0  ;;  %v499_v25 = vpop.f32.mrf.mxu1 }
  0xba   : > { %1041 = vst [vmem:[%s1240_s12 + $0x8] sm:$0xff] %v969_v14   ;;  %v557_v32 = vmul.f32 %v1218_v22, %v479_v23  ;;  %v565_v33 = vmul.f32 %v1218_v22, %v499_v25 }
  0xbb   : > { %1045 = vst [vmem:[%s1240_s12 + $0x28] sm:$0xff] %v989_v15   ;;  %v608_v26 = vadd.f32 %v1224_v24, %v572_v20  ;;  %v616_v27 = vadd.f32 %v1224_v24, %v580_v21 }
  0xbc   : > { %v593_v40 = vadd.f32 %v1224_v24, %v557_v32  ;;  %v601_v41 = vadd.f32 %v1224_v24, %v565_v33 }
  0xbd   : > { %v640_v30 = vmax.f32 %v608_v26, 0.0  ;;  %v648_v31 = vmax.f32 %v616_v27, 0.0 }
  0xbe   : > { %v625_v48 = vmax.f32 %v593_v40, 0.0  ;;  %v633_v49 = vmax.f32 %v601_v41, 0.0 }
  0xbf   : > { %v1009_v34 = vpack.c.bf16 %v640_v30, %v639_v28  ;;  %v1029_v35 = vpack.c.bf16 %v648_v31, %v647_v29 }
  0xc0   : > { %v519_v36 = vpop.f32.mrf.mxu2  ;;  %v539_v37 = vpop.f32.mrf.mxu3 }
  0xc1   : > { %1049 = vst [vmem:[%s1240_s12 + $0x48] sm:$0xff] %v1009_v34   ;;  %v481_v38 = vpop.f32.mrf.mxu0  ;;  %v501_v39 = vpop.f32.mrf.mxu1  ;;  %v573_v46 = vmul.f32 %v1218_v22, %v519_v36  ;;  %v581_v47 = vmul.f32 %v1218_v22, %v539_v37 }
  0xc2   : > { %1053 = vst [vmem:[%s1240_s12 + $0x68] sm:$0xff] %v1029_v35   ;;  %v558_v42 = vmul.f32 %v1218_v22, %v481_v38  ;;  %v566_v43 = vmul.f32 %v1218_v22, %v501_v39 }
  0xc3   : > { %v609_v56 = vadd.f32 %v1224_v24, %v573_v46  ;;  %v617_v57 = vadd.f32 %v1224_v24, %v581_v47 }
  0xc4   : > { %v594_v44 = vadd.f32 %v1224_v24, %v558_v42  ;;  %v602_v45 = vadd.f32 %v1224_v24, %v566_v43 }
  0xc5   : > { %v641_v0 = vmax.f32 %v609_v56, 0.0  ;;  %v649_v1 = vmax.f32 %v617_v57, 0.0 }
  0xc6   : > { %v626_v50 = vmax.f32 %v594_v44, 0.0  ;;  %v634_v51 = vmax.f32 %v602_v45, 0.0 }
  0xc8   : > { %v974_v52 = vpack.c.bf16 %v626_v50, %v625_v48  ;;  %v994_v53 = vpack.c.bf16 %v634_v51, %v633_v49  ;;  %v521_v54 = vpop.f32.mrf.mxu2  ;;  %v541_v55 = vpop.f32.mrf.mxu3 }
  0xc9   : > { %v574_v58 = vmul.f32 %v1218_v22, %v521_v54  ;;  %v582_v59 = vmul.f32 %v1218_v22, %v541_v55  ;;  %v484_v60 = vpop.f32.mrf.mxu0  ;;  %v504_v61 = vpop.f32.mrf.mxu1 }
  0xca   : > { %1042 = vst [vmem:[%s1240_s12 + $0x10] sm:$0xff] %v974_v52   ;;  %v559_v4 = vmul.f32 %v1218_v22, %v484_v60  ;;  %v567_v5 = vmul.f32 %v1218_v22, %v504_v61 }
  0xcb   : > { %1046 = vst [vmem:[%s1240_s12 + $0x30] sm:$0xff] %v994_v53   ;;  %v610_v62 = vadd.f32 %v1224_v24, %v574_v58  ;;  %v618_v63 = vadd.f32 %v1224_v24, %v582_v59 }
  0xcc   : > { %v595_v12 = vadd.f32 %v1224_v24, %v559_v4  ;;  %v603_v13 = vadd.f32 %v1224_v24, %v567_v5 }
  0xcd   : > { %v642_v2 = vmax.f32 %v610_v62, 0.0  ;;  %v650_v3 = vmax.f32 %v618_v63, 0.0 }
  0xce   : > { %v627_v20 = vmax.f32 %v595_v12, 0.0  ;;  %v635_v21 = vmax.f32 %v603_v13, 0.0 }
  0xcf   : > { %v1014_v6 = vpack.c.bf16 %v642_v2, %v641_v0  ;;  %v1034_v7 = vpack.c.bf16 %v650_v3, %v649_v1 }
  0xd0   : > { %v524_v8 = vpop.f32.mrf.mxu2  ;;  %v544_v9 = vpop.f32.mrf.mxu3 }
  0xd1   : > { %1050 = vst [vmem:[%s1240_s12 + $0x50] sm:$0xff] %v1014_v6   ;;  %v486_v10 = vpop.f32.mrf.mxu0  ;;  %v506_v11 = vpop.f32.mrf.mxu1  ;;  %v575_v18 = vmul.f32 %v1218_v22, %v524_v8  ;;  %v583_v19 = vmul.f32 %v1218_v22, %v544_v9 }
  0xd2   : > { %1054 = vst [vmem:[%s1240_s12 + $0x70] sm:$0xff] %v1034_v7   ;;  %v560_v14 = vmul.f32 %v1218_v22, %v486_v10  ;;  %v568_v15 = vmul.f32 %v1218_v22, %v506_v11 }
  0xd3   : > { %v611_v30 = vadd.f32 %v1224_v24, %v575_v18  ;;  %v619_v31 = vadd.f32 %v1224_v24, %v583_v19 }
  0xd4   : > { %v596_v16 = vadd.f32 %v1224_v24, %v560_v14  ;;  %v604_v17 = vadd.f32 %v1224_v24, %v568_v15 }
  0xd5   : > { %v643_v36 = vmax.f32 %v611_v30, 0.0  ;;  %v651_v37 = vmax.f32 %v619_v31, 0.0 }
  0xd6   : > { %v628_v23 = vmax.f32 %v596_v16, 0.0  ;;  %v636_v25 = vmax.f32 %v604_v17, 0.0 }
  0xd8   : > { %v979_v26 = vpack.c.bf16 %v628_v23, %v627_v20  ;;  %v999_v27 = vpack.c.bf16 %v636_v25, %v635_v21  ;;  %v526_v28 = vpop.f32.mrf.mxu2  ;;  %v546_v29 = vpop.f32.mrf.mxu3 }
  0xd9   : > { %v576_v32 = vmul.f32 %v1218_v22, %v526_v28  ;;  %v584_v33 = vmul.f32 %v1218_v22, %v546_v29 }
  0xda   : > { %1043 = vst [vmem:[%s1240_s12 + $0x18] sm:$0xff] %v979_v26  }
  0xdb   : > { %1047 = vst [vmem:[%s1240_s12 + $0x38] sm:$0xff] %v999_v27   ;;  %v612_v34 = vadd.f32 %v1224_v24, %v576_v32  ;;  %v620_v35 = vadd.f32 %v1224_v24, %v584_v33 }
  0xdd   : > { %v644_v38 = vmax.f32 %v612_v34, 0.0  ;;  %v652_v39 = vmax.f32 %v620_v35, 0.0 }
  0xdf   : > { %v1019_v40 = vpack.c.bf16 %v644_v38, %v643_v36  ;;  %v1039_v41 = vpack.c.bf16 %v652_v39, %v651_v37 }
  0xe1   : > { %1051 = vst [vmem:[%s1240_s12 + $0x58] sm:$0xff] %v1019_v40  }
  0xe2   : > { %1055 = vst [vmem:[%s1240_s12 + $0x78] sm:$0xff] %v1039_v41  }
  0xe3 PF: > { %s14_s17 = sadd.s32 1, %s1116_s17   ;;  %s1326_s15 = smov %s1112_s16 }
  0xe4   : > { %p11_p5 = scmp.ge.s32.totalorder %s14_s17, 4   ;;  %s1327_s16 = smov %s1329_s18 }
  0xe6   :  { %13 = sbr.rel (!%p11_p5) target bundleno = 2 (0x2), region = 75 }

</bundles_post_ra>
